<compile_context>
chip_gen: v6e
topology: v6e:2x2x1
jax: 0.10.0
libtpu: 0.0.40
codegen_flags: <defaults>
</compile_context>

<pallas_src>
import jax
import jax.numpy as jnp
from jax import lax
from jax.experimental import pallas as pl
from jax.experimental.pallas import tpu as pltpu


def pam_attn_kernel(gamma_ref, q_ref, k_ref, v_ref, x_ref, o_ref):
    """One (batch b, query-tile qi) grid step.

    gamma_ref : (1, 1)        SMEM f32
    q_ref     : (1, TQ, Cqp)  VMEM  query tile (already projected, Cq padded to Cqp)
    k_ref     : (1, N,  Cqp)  VMEM  full keys for this batch (resident across qi)
    v_ref     : (1, N,  C)    VMEM  full values for this batch (resident across qi)
    x_ref     : (1, TQ, C)    VMEM  input tile for the residual
    o_ref     : (1, TQ, C)    VMEM  output tile
    """
    q = q_ref[0]                                              # (TQ, Cqp)
    k = k_ref[0]                                              # (N,  Cqp)
    v = v_ref[0]                                              # (N,  C)

    # energy[i, j] = sum_d q[i, d] * k[j, d]   (canonical q @ k^T, f32 accumulate)
    energy = lax.dot_general(q, k, (((1,), (1,)), ((), ())),
                             preferred_element_type=jnp.float32)   # (TQ, N) f32

    # Numerically stable row softmax statistics (normalization deferred).
    m = jnp.max(energy, axis=-1, keepdims=True)               # (TQ, 1)
    p = jnp.exp(energy - m)                                   # (TQ, N) f32
    denom = jnp.sum(p, axis=-1, keepdims=True)                # (TQ, 1)

    # Unnormalized out[i, c] = sum_j p[i, j] * v[j, c]   (att @ v, f32 accumulate)
    out_un = jnp.dot(p.astype(v.dtype), v,
                     preferred_element_type=jnp.float32)       # (TQ, C) f32

    # Fold gamma and the softmax normalization into one (TQ, 1) scale.
    scale = gamma_ref[0, 0] * pl.reciprocal(denom, approx=False)
    o_ref[0] = (scale * out_un + x_ref[0].astype(jnp.float32)).astype(o_ref.dtype)


def _pick_tq(n):
    for cand in (256, 128):
        if n % cand == 0:
            return cand
    # Fallback: largest divisor of N that is a multiple of 8 (<= 512), else N.
    # TODO(synk): for awkward spatial sizes (e.g. 97x97) pad/mask N instead of
    # falling back to a single huge tile.
    for t in range(min(n, 512), 7, -1):
        if n % t == 0 and t % 8 == 0:
            return t
    return n


def pam_module_forward(x, wq, bq, wk, bk, wv, bv, gamma, *, tq=None, mxu_dtype=None):
    """x: (B, C, H, W); wq/wk: (C//8, C); wv: (C, C); bq/bk: (C//8,); bv: (C,).

    mxu_dtype: dtype used for MXU matmul operands inside the kernel (default:
    x.dtype).  Pass jnp.bfloat16 for the fast MXU path on f32 inputs (~1e-2 tol).
    """
    B, C, H, W = x.shape
    N = H * W
    Cq = wq.shape[0]
    dt = x.dtype if mxu_dtype is None else jnp.dtype(mxu_dtype)
    itemsize = jnp.dtype(dt).itemsize

    if tq is None:
        tq = _pick_tq(N)
    assert N % tq == 0, "spatial size must be divisible by the query tile"

    # Zero-pad Cq up to a multiple of 128 (lane-dense q/k, full-lane contraction).
    Cqp = max(128, ((Cq + 127) // 128) * 128)
    f32 = jnp.float32
    wq_p = jnp.zeros((Cqp, C), f32).at[:Cq].set(wq.astype(f32))
    wk_p = jnp.zeros((Cqp, C), f32).at[:Cq].set(wk.astype(f32))
    bq_p = jnp.zeros((Cqp,), f32).at[:Cq].set(bq.astype(f32))
    bk_p = jnp.zeros((Cqp,), f32).at[:Cq].set(bk.astype(f32))

    # NCHW -> (B, N, C): flash-canonical row=position, col=channel layout.
    x_t = jnp.transpose(x.reshape(B, C, N), (0, 2, 1))

    # Hoisted 1x1-conv projections (plain XLA GEMMs, f32 accumulation).
    xm = x_t.astype(dt)
    q = (jnp.einsum("bnc,oc->bno", xm, wq_p.astype(dt),
                    preferred_element_type=f32) + bq_p).astype(dt)   # (B, N, Cqp)
    k = (jnp.einsum("bnc,oc->bno", xm, wk_p.astype(dt),
                    preferred_element_type=f32) + bk_p).astype(dt)   # (B, N, Cqp)
    v = (jnp.einsum("bnc,oc->bno", xm, wv.astype(dt),
                    preferred_element_type=f32)
         + bv.astype(f32)).astype(dt)                                # (B, N, C)

    gamma_arr = jnp.asarray(gamma, f32).reshape(1, 1)

    # VMEM budget from shapes (double-buffered blocks + f32 temporaries + headroom).
    blocks = 2 * (tq * Cqp + N * Cqp + N * C + 2 * tq * C) * itemsize
    temps = (2 * tq * N + tq * C + 2 * tq) * 4
    vmem_limit = min(int(blocks + temps) + 8 * 1024 * 1024, 100 * 1024 * 1024)

    cost = pl.CostEstimate(
        flops=int(2 * B * N * N * (Cqp + C) + 4 * B * N * C),
        transcendentals=int(B * N * N),
        bytes_accessed=int(itemsize * B * (2 * N * Cqp + 3 * N * C)),
    )

    out_t = pl.pallas_call(
        pam_attn_kernel,
        out_shape=jax.ShapeDtypeStruct((B, N, C), dt),
        grid_spec=pltpu.PrefetchScalarGridSpec(
            num_scalar_prefetch=0,
            grid=(B, N // tq),
            in_specs=[
                pl.BlockSpec((1, 1), lambda b, qi: (0, 0),
                             memory_space=pltpu.SMEM),                # gamma
                pl.BlockSpec((1, tq, Cqp), lambda b, qi: (b, qi, 0)),  # q tile
                pl.BlockSpec((1, N, Cqp), lambda b, qi: (b, 0, 0)),    # K (resident)
                pl.BlockSpec((1, N, C), lambda b, qi: (b, 0, 0)),      # V (resident)
                pl.BlockSpec((1, tq, C), lambda b, qi: (b, qi, 0)),    # x tile (residual)
            ],
            out_specs=pl.BlockSpec((1, tq, C), lambda b, qi: (b, qi, 0)),
        ),
        compiler_params=pltpu.CompilerParams(
            # Projections are hoisted, so both axes are independent:
            # megacore / multi-TC can split either batch or query tiles.
            dimension_semantics=("parallel", "parallel"),
            vmem_limit_bytes=vmem_limit,
        ),
        cost_estimate=cost,
    )(gamma_arr, q, k, v, xm)

    # TODO(synk): for very large N (N*C*4 > ~24 MiB on v7x) add a KV-block grid
    # axis with online-softmax accumulators instead of fully resident K/V.

    # (B, N, C) -> (B, C, H, W)
    return jnp.transpose(out_t, (0, 2, 1)).reshape(B, C, H, W).astype(x.dtype)


def pam_module_ref(x, wq, bq, wk, bk, wv, bv, gamma):
    """Pure-JAX f32 reference mirroring the PyTorch forward."""
    B, C, H, W = x.shape
    N = H * W
    f32 = jnp.float32
    xf = x.reshape(B, C, N).astype(f32)
    q = jnp.einsum("oc,bcn->bon", wq.astype(f32), xf) + bq.astype(f32)[None, :, None]
    k = jnp.einsum("oc,bcn->bon", wk.astype(f32), xf) + bk.astype(f32)[None, :, None]
    v = jnp.einsum("oc,bcn->bon", wv.astype(f32), xf) + bv.astype(f32)[None, :, None]
    energy = jnp.einsum("bci,bcj->bij", q, k)                # (B, N, N)
    att = jax.nn.softmax(energy, axis=-1)
    out = jnp.einsum("bcj,bij->bci", v, att)                 # (B, C, N)
    out = out.reshape(B, C, H, W)
    return gamma * out + xf.reshape(B, C, H, W)


if __name__ == "__main__":
    key = jax.random.PRNGKey(0)
    # in_dim must be >= 8 so that in_dim // 8 >= 1 (PyTorch Conv2d needs out_channels >= 1).
    B, C, H, W = 2, 32, 16, 16
    Cq = C // 8
    kx, kwq, kbq, kwk, kbk, kwv, kbv = jax.random.split(key, 7)

    x = jax.random.normal(kx, (B, C, H, W), dtype=jnp.float32)
    bound = 1.0 / (C ** 0.5)  # PyTorch Conv2d default init range
    wq = jax.random.uniform(kwq, (Cq, C), jnp.float32, -bound, bound)
    bq = jax.random.uniform(kbq, (Cq,), jnp.float32, -bound, bound)
    wk = jax.random.uniform(kwk, (Cq, C), jnp.float32, -bound, bound)
    bk = jax.random.uniform(kbk, (Cq,), jnp.float32, -bound, bound)
    wv = jax.random.uniform(kwv, (C, C), jnp.float32, -bound, bound)
    bv = jax.random.uniform(kbv, (C,), jnp.float32, -bound, bound)

    # gamma = 0, matching nn.Parameter(torch.zeros(1)) init: output == x.
    g0 = jnp.float32(0.0)
    out0 = pam_module_forward(x, wq, bq, wk, bk, wv, bv, g0)
    jax.block_until_ready(out0)
    ref0 = pam_module_ref(x, wq, bq, wk, bk, wv, bv, g0)
    assert jnp.allclose(out0, ref0, atol=1e-5, rtol=1e-5)

    # Non-zero gamma exercises the full attention path (f32, tight tolerance).
    g1 = jnp.float32(0.5)
    out1 = pam_module_forward(x, wq, bq, wk, bk, wv, bv, g1)
    jax.block_until_ready(out1)
    ref1 = pam_module_ref(x, wq, bq, wk, bk, wv, bv, g1)
    assert jnp.allclose(out1, ref1, atol=1e-5, rtol=1e-5)

    # bf16 fast path: MXU-native matmul operands with f32 accumulation.
    bf = jnp.bfloat16
    out_bf = pam_module_forward(x.astype(bf), wq.astype(bf), bq, wk.astype(bf),
                                bk, wv.astype(bf), bv, g1)
    jax.block_until_ready(out_bf)
    assert jnp.allclose(out_bf.astype(jnp.float32), ref1, atol=1e-1, rtol=1e-1)

    # Explicit bf16-operand path on f32 inputs (v6e/v7x MXU fast path, looser tol).
    out_mix = pam_module_forward(x, wq, bq, wk, bk, wv, bv, g1, mxu_dtype=bf)
    jax.block_until_ready(out_mix)
    assert jnp.allclose(out_mix, ref1, atol=5e-2, rtol=5e-2)

    print("KERNEL_OK")
</pallas_src>

<mosaic_0001>
module attributes {stable_mosaic.version = 11 : i64} {
  func.func @pam_attn_kernel(%arg0: i32, %arg1: i32, %arg2: memref<1x1xf32, #tpu.memory_space<smem>>, %arg3: memref<1x256x128xf32, #tpu.memory_space<vmem>>, %arg4: memref<1x256x128xf32, #tpu.memory_space<vmem>>, %arg5: memref<1x256x32xf32, #tpu.memory_space<vmem>>, %arg6: memref<1x256x32xf32, #tpu.memory_space<vmem>>, %arg7: memref<1x256x32xf32, #tpu.memory_space<vmem>>) attributes {dimension_semantics = [#tpu.dimension_semantics<parallel>, #tpu.dimension_semantics<parallel>], iteration_bounds = array<i64: 2, 1>, scalar_prefetch = 0 : i64, scratch_operands = 0 : i64, tpu.core_type = #tpu.core_type<tc>, window_params = [{transform_indices = @transform_0, window_bounds = array<i64: 1, 1>}, {transform_indices = @transform_1, window_bounds = array<i64: 1, 256, 128>}, {transform_indices = @transform_2, window_bounds = array<i64: 1, 256, 128>}, {transform_indices = @transform_3, window_bounds = array<i64: 1, 256, 32>}, {transform_indices = @transform_4, window_bounds = array<i64: 1, 256, 32>}, {transform_indices = @transform_5, window_bounds = array<i64: 1, 256, 32>}]} {
    %c0 = arith.constant 0 : index
    %c0_0 = arith.constant 0 : index
    %c0_1 = arith.constant 0 : index
    %0 = vector.load %arg3[%c0, %c0_0, %c0_1] : memref<1x256x128xf32, #tpu.memory_space<vmem>>, vector<1x256x128xf32>
    %1 = vector.shape_cast %0 : vector<1x256x128xf32> to vector<256x128xf32>
    %c0_2 = arith.constant 0 : index
    %c0_3 = arith.constant 0 : index
    %c0_4 = arith.constant 0 : index
    %2 = vector.load %arg4[%c0_2, %c0_3, %c0_4] : memref<1x256x128xf32, #tpu.memory_space<vmem>>, vector<1x256x128xf32>
    %3 = vector.shape_cast %2 : vector<1x256x128xf32> to vector<256x128xf32>
    %c0_5 = arith.constant 0 : index
    %c0_6 = arith.constant 0 : index
    %c0_7 = arith.constant 0 : index
    %4 = vector.load %arg5[%c0_5, %c0_6, %c0_7] : memref<1x256x32xf32, #tpu.memory_space<vmem>>, vector<1x256x32xf32>
    %5 = vector.shape_cast %4 : vector<1x256x32xf32> to vector<256x32xf32>
    %cst = arith.constant dense<0.000000e+00> : vector<256x256xf32>
    %6 = tpu.matmul %1, %3, %cst {dimension_numbers = #tpu.dot_dimension_numbers<[1], [1], [0], [0], [0, 0, 1, 0], [], []>} : vector<256x128xf32>, vector<256x128xf32>, vector<256x256xf32> -> vector<256x256xf32>
    %cst_8 = arith.constant dense<0xFF800000> : vector<256xf32>
    %7 = vector.multi_reduction <maximumf>, %6, %cst_8 [1] : vector<256x256xf32> to vector<256xf32>
    %8 = vector.shape_cast %7 : vector<256xf32> to vector<256x1xf32>
    %9 = vector.broadcast %8 : vector<256x1xf32> to vector<256x256xf32>
    %10 = arith.subf %6, %9 : vector<256x256xf32>
    %11 = math.exp %10 : vector<256x256xf32>
    %cst_9 = arith.constant dense<0.000000e+00> : vector<256xf32>
    %12 = vector.multi_reduction <add>, %11, %cst_9 [1] : vector<256x256xf32> to vector<256xf32>
    %13 = vector.shape_cast %12 : vector<256xf32> to vector<256x1xf32>
    %cst_10 = arith.constant dense<0.000000e+00> : vector<256x32xf32>
    %14 = tpu.matmul %11, %5, %cst_10 {dimension_numbers = #tpu.dot_dimension_numbers<[1], [0], [0], [1], [0, 0, 1, 1], [], []>} : vector<256x256xf32>, vector<256x32xf32>, vector<256x32xf32> -> vector<256x32xf32>
    %c0_11 = arith.constant 0 : index
    %c0_12 = arith.constant 0 : index
    %15 = memref.load %arg2[%c0_11, %c0_12] : memref<1x1xf32, #tpu.memory_space<smem>>
    %16 = tpu.reciprocal %13 : vector<256x1xf32> -> vector<256x1xf32>
    %17 = vector.broadcast %15 : f32 to vector<256x1xf32>
    %18 = arith.mulf %17, %16 : vector<256x1xf32>
    %19 = vector.broadcast %18 : vector<256x1xf32> to vector<256x32xf32>
    %20 = arith.mulf %19, %14 : vector<256x32xf32>
    %c0_13 = arith.constant 0 : index
    %c0_14 = arith.constant 0 : index
    %c0_15 = arith.constant 0 : index
    %21 = vector.load %arg6[%c0_13, %c0_14, %c0_15] : memref<1x256x32xf32, #tpu.memory_space<vmem>>, vector<1x256x32xf32>
    %22 = vector.shape_cast %21 : vector<1x256x32xf32> to vector<256x32xf32>
    %23 = arith.addf %20, %22 : vector<256x32xf32>
    %c0_16 = arith.constant 0 : index
    %c0_17 = arith.constant 0 : index
    %c0_18 = arith.constant 0 : index
    %24 = vector.load %arg7[%c0_16, %c0_17, %c0_18] : memref<1x256x32xf32, #tpu.memory_space<vmem>>, vector<1x256x32xf32>
    %25 = vector.shape_cast %24 : vector<1x256x32xf32> to vector<256x32xf32>
    %26 = vector.shape_cast %23 : vector<256x32xf32> to vector<1x256x32xf32>
    tpu.vector_store %arg7[%c0_16, %c0_17, %c0_18], %26 {strides = array<i32>} : memref<1x256x32xf32, #tpu.memory_space<vmem>>, vector<1x256x32xf32>,
    return
  }
  func.func @transform_0(%arg0: i32, %arg1: i32) -> (i32, i32) {
    %c0_i32 = arith.constant 0 : i32
    %c0_i32_0 = arith.constant 0 : i32
    %c0_i32_1 = arith.constant 0 : i32
    return %c0_i32, %c0_i32_0 : i32, i32
  }
  func.func @transform_1(%arg0: i32, %arg1: i32) -> (i32, i32, i32) {
    %c0_i32 = arith.constant 0 : i32
    %c0_i32_0 = arith.constant 0 : i32
    return %arg0, %arg1, %c0_i32 : i32, i32, i32
  }
  func.func @transform_2(%arg0: i32, %arg1: i32) -> (i32, i32, i32) {
    %c0_i32 = arith.constant 0 : i32
    %c0_i32_0 = arith.constant 0 : i32
    %c0_i32_1 = arith.constant 0 : i32
    return %arg0, %c0_i32, %c0_i32_0 : i32, i32, i32
  }
  func.func @transform_3(%arg0: i32, %arg1: i32) -> (i32, i32, i32) {
    %c0_i32 = arith.constant 0 : i32
    %c0_i32_0 = arith.constant 0 : i32
    %c0_i32_1 = arith.constant 0 : i32
    return %arg0, %c0_i32, %c0_i32_0 : i32, i32, i32
  }
  func.func @transform_4(%arg0: i32, %arg1: i32) -> (i32, i32, i32) {
    %c0_i32 = arith.constant 0 : i32
    %c0_i32_0 = arith.constant 0 : i32
    return %arg0, %arg1, %c0_i32 : i32, i32, i32
  }
  func.func @transform_5(%arg0: i32, %arg1: i32) -> (i32, i32, i32) {
    %c0_i32 = arith.constant 0 : i32
    %c0_i32_0 = arith.constant 0 : i32
    return %arg0, %arg1, %c0_i32 : i32, i32, i32
  }
}

</mosaic_0001>

<bundles_post_ra>
// kernel: tpu_custom_call.1
= control target key start
LH: loop header
LB: loop body
LE: loop exit
PB: predicated region body
PF: predicated region fallthrough
CT: control target
= control target key end

     0   :  { %s2020_s20 = smov 0   ;;  %s2022_s21 = smov 0   ;;  %s2593_s0 = inlined_call_operand.<no memory space> [shape: f32[1,1], index: 0, kind: input, shape index: {}]   ;;  %s2594_s1 = inlined_call_operand.vmem [shape: f32[2,256,128], index: 1, kind: input, shape index: {}]   ;;  %s2595_s2 = inlined_call_operand.vmem [shape: f32[2,256,128], index: 2, kind: input, shape index: {}]   ;;  %s2596_s3 = inlined_call_operand.vmem [shape: f32[2,256,32], index: 3, kind: input, shape index: {}]   ;;  %s2597_s4 = inlined_call_operand.vmem [shape: f32[2,256,32], index: 4, kind: input, shape index: {}]   ;;  %s2598_s5 = inlined_call_operand.vmem [shape: f32[2,256,32], index: 5, kind: output, shape index: {}]  }
   0x1   :  { %10 = sst [smem:[#allocation2]] %s2593_s0  ;;  %s2024_s22 = smov 0  }
   0x2 LB: > { %s28_s0 = sadd.s32 1, %s1980_s21  ;;  %p1631_p0 = scmp.ge.s32.totalorder %s1984_s22, 1  ;;  %s1984_s22 = sphi %s2024_s22, %s16_s22   ;;  %s1980_s21 = sphi %s2022_s21, %s2639_s21   ;;  %s1976_s20 = sphi %s2020_s20, %s2638_s20  }
   0x3   : > { %p30_p1 = scmp.ge.s32.totalorder %s28_s0, 2  ;;  %p246_p2 = scmp.lt.s32.totalorder %s1984_s22, 3 }
   0x5   : > { %s2641_s0 = smov (%p30_p1, %s28_s0), 0  ;;  %p247_p3 = pnand %p1631_p0, %p246_p2 }
   0x7   : > { %250 = sbr.rel (%p247_p3) target bundleno = 759 (0x2f7), region = 40 }
   0xc   : > { %p302_p4 = scmp.lt.s32.totalorder %s1976_s20, 1  ;;  %s1303_s8 = sld [smem:[#allocation2]]  ;;  %vm1465_vm0 = vcmask 261120  }
   0xe   : > { %s2643_s20 = smov (!%p302_p4, %s1976_s20), 1 }
   0xf   : > { %s2038_s23 = sshll.u32 %s2643_s20, 8 }
  0x10   : > { %s2044_s26 = scalar_lea.vmem %s2595_s2, %s2038_s23  ;;  %s2056_s29 = scalar_lea.vmem %s2594_s1, %s2038_s23 }
  0x11   : > { %v404_v0 = vld [vmem:[%s2044_s26 + $0xf8] sm:$0xff]  ;;  %v403_v2 = vld [vmem:[%s2044_s26 + $0xf0] sm:$0xff]  ;;  %v402_v4 = vld [vmem:[%s2044_s26 + $0xe8] sm:$0xff]  ;;  %s2120_s7 = scalar_lea.vmem %s2596_s3, %s2038_s23  ;;  %s2448_s11 = scalar_lea.vmem %s2597_s4, %s2038_s23 }
  0x12   : > { %v388_v1 = vld [vmem:[%s2044_s26 + $0x78] sm:$0xff]  ;;  %1649 = vmatprep.subr.mxu0 %v404_v0  ;;  %v387_v3 = vld [vmem:[%s2044_s26 + $0x70] sm:$0xff]  ;;  %v386_v5 = vld [vmem:[%s2044_s26 + $0x68] sm:$0xff]  ;;  %v1986_v0 = vmov 0.0   ;;  %s2456_s14 = scalar_lea.vmem %s2598_s5, %s2038_s23 }
  0x13   : > { %1650 = vmatpush3.xpose.msra.mxu0 %v388_v1  ;;  %v401_v6 = vld [vmem:[%s2044_s26 + $0xe0] sm:$0xff]  ;;  %v400_v9 = vld [vmem:[%s2044_s26 + $0xd8] sm:$0xff]  ;;  %v399_v11 = vld [vmem:[%s2044_s26 + $0xd0] sm:$0xff]  ;;  %1078 = vmatprep.subr.mxu1 %v1986_v0 }
  0x14   : > { %1651 = vmatprep.subr.mxu0 %v403_v2  ;;  %v341_v7 = vld [vmem:[%s2056_s29] sm:$0xff]  ;;  %v384_v10 = vld [vmem:[%s2044_s26 + $0x58] sm:$0xff]  ;;  %v383_v12 = vld [vmem:[%s2044_s26 + $0x50] sm:$0xff] }
  0x15   : > { %v385_v8 = vld [vmem:[%s2044_s26 + $0x60] sm:$0xff]  ;;  %1681 = vmatprep.mubr.f32.mxu0 %v341_v7  ;;  %v398_v13 = vld [vmem:[%s2044_s26 + $0xc8] sm:$0xff]  ;;  %v396_v17 = vld [vmem:[%s2044_s26 + $0xb8] sm:$0xff] }
  0x16   : > { %v382_v14 = vld [vmem:[%s2044_s26 + $0x48] sm:$0xff]  ;;  %v397_v15 = vld [vmem:[%s2044_s26 + $0xc0] sm:$0xff]  ;;  %v380_v18 = vld [vmem:[%s2044_s26 + $0x38] sm:$0xff] }
  0x17   : > { %1652 = vmatpush3.xpose.msra.mxu0 %v387_v3  ;;  %v381_v16 = vld [vmem:[%s2044_s26 + $0x40] sm:$0xff]  ;;  %v395_v19 = vld [vmem:[%s2044_s26 + $0xb0] sm:$0xff]  ;;  %v394_v21 = vld [vmem:[%s2044_s26 + $0xa8] sm:$0xff] }
  0x18   : > { %1653 = vmatprep.subr.mxu0 %v402_v4  ;;  %v379_v20 = vld [vmem:[%s2044_s26 + $0x30] sm:$0xff]  ;;  %v378_v22 = vld [vmem:[%s2044_s26 + $0x28] sm:$0xff]  ;;  %v393_v23 = vld [vmem:[%s2044_s26 + $0xa0] sm:$0xff] }
  0x19   : > { %v377_v24 = vld [vmem:[%s2044_s26 + $0x20] sm:$0xff]  ;;  %v392_v25 = vld [vmem:[%s2044_s26 + $0x98] sm:$0xff]  ;;  %v391_v27 = vld [vmem:[%s2044_s26 + $0x90] sm:$0xff] }
  0x1a   : > { %v376_v26 = vld [vmem:[%s2044_s26 + $0x18] sm:$0xff]  ;;  %v375_v28 = vld [vmem:[%s2044_s26 + $0x10] sm:$0xff]  ;;  %v390_v29 = vld [vmem:[%s2044_s26 + $0x88] sm:$0xff] }
  0x1b   : > { %1654 = vmatpush3.xpose.msra.mxu0 %v386_v5  ;;  %v374_v30 = vld [vmem:[%s2044_s26 + $0x8] sm:$0xff]  ;;  %v389_v31 = vld [vmem:[%s2044_s26 + $0x80] sm:$0xff]  ;;  %v343_v34 = vld [vmem:[%s2056_s29 + $0x10] sm:$0xff] }
  0x1c   : > { %1655 = vmatprep.subr.mxu0 %v401_v6  ;;  %v373_v32 = vld [vmem:[%s2044_s26] sm:$0xff]  ;;  %v342_v33 = vld [vmem:[%s2056_s29 + $0x8] sm:$0xff]  ;;  %v344_v35 = vld [vmem:[%s2056_s29 + $0x18] sm:$0xff] }
  0x1d   : > { %v345_v36 = vld [vmem:[%s2056_s29 + $0x20] sm:$0xff]  ;;  %v346_v37 = vld [vmem:[%s2056_s29 + $0x28] sm:$0xff]  ;;  %v347_v38 = vld [vmem:[%s2056_s29 + $0x30] sm:$0xff] }
  0x1e   : > { %v348_v39 = vld [vmem:[%s2056_s29 + $0x38] sm:$0xff]  ;;  %v349_v40 = vld [vmem:[%s2056_s29 + $0x40] sm:$0xff]  ;;  %v350_v41 = vld [vmem:[%s2056_s29 + $0x48] sm:$0xff] }
  0x1f   : > { %1656 = vmatpush3.xpose.msra.mxu0 %v385_v8  ;;  %v351_v42 = vld [vmem:[%s2056_s29 + $0x50] sm:$0xff]  ;;  %v352_v43 = vld [vmem:[%s2056_s29 + $0x58] sm:$0xff]  ;;  %v353_v44 = vld [vmem:[%s2056_s29 + $0x60] sm:$0xff] }
  0x20   : > { %1657 = vmatprep.subr.mxu0 %v400_v9  ;;  %v354_v45 = vld [vmem:[%s2056_s29 + $0x68] sm:$0xff]  ;;  %v355_v46 = vld [vmem:[%s2056_s29 + $0x70] sm:$0xff]  ;;  %v356_v47 = vld [vmem:[%s2056_s29 + $0x78] sm:$0xff] }
  0x21   : > { %v357_v48 = vld [vmem:[%s2056_s29 + $0x80] sm:$0xff]  ;;  %v358_v49 = vld [vmem:[%s2056_s29 + $0x88] sm:$0xff]  ;;  %v359_v50 = vld [vmem:[%s2056_s29 + $0x90] sm:$0xff] }
  0x22   : > { %v360_v51 = vld [vmem:[%s2056_s29 + $0x98] sm:$0xff]  ;;  %v361_v52 = vld [vmem:[%s2056_s29 + $0xa0] sm:$0xff]  ;;  %v362_v53 = vld [vmem:[%s2056_s29 + $0xa8] sm:$0xff] }
  0x23   : > { %1658 = vmatpush3.xpose.msra.mxu0 %v384_v10  ;;  %v363_v54 = vld [vmem:[%s2056_s29 + $0xb0] sm:$0xff]  ;;  %v364_v55 = vld [vmem:[%s2056_s29 + $0xb8] sm:$0xff]  ;;  %v365_v56 = vld [vmem:[%s2056_s29 + $0xc0] sm:$0xff] }
  0x24   : > { %1659 = vmatprep.subr.mxu0 %v399_v11  ;;  %v366_v57 = vld [vmem:[%s2056_s29 + $0xc8] sm:$0xff]  ;;  %v367_v58 = vld [vmem:[%s2056_s29 + $0xd0] sm:$0xff]  ;;  %v368_v59 = vld [vmem:[%s2056_s29 + $0xd8] sm:$0xff] }
  0x25   : > { %v369_v60 = vld [vmem:[%s2056_s29 + $0xe0] sm:$0xff]  ;;  %v370_v61 = vld [vmem:[%s2056_s29 + $0xe8] sm:$0xff]  ;;  %v371_v62 = vld [vmem:[%s2056_s29 + $0xf0] sm:$0xff] }
  0x26   : > { %v372_v63 = vld [vmem:[%s2056_s29 + $0xf8] sm:$0xff]  ;;  %v419_v2 = vld [vmem:[%s2120_s7 + $0x70] sm:$0xff]  ;;  %v418_v3 = vld [vmem:[%s2120_s7 + $0x68] sm:$0xff] }
  0x27   : > { %1660 = vmatpush3.xpose.msra.mxu0 %v383_v12  ;;  %v420_v1 = vld [vmem:[%s2120_s7 + $0x78] sm:$0xff]  ;;  %v417_v4 = vld [vmem:[%s2120_s7 + $0x60] sm:$0xff]  ;;  %v415_v6 = vld [vmem:[%s2120_s7 + $0x50] sm:$0xff] }
  0x28   : > { %1661 = vmatprep.subr.mxu0 %v398_v13  ;;  %1079 = vmatpush1.msra.mxu1 %v420_v1  ;;  %v416_v5 = vld [vmem:[%s2120_s7 + $0x58] sm:$0xff]  ;;  %v413_v8 = vld [vmem:[%s2120_s7 + $0x40] sm:$0xff]  ;;  %v411_v10 = vld [vmem:[%s2120_s7 + $0x30] sm:$0xff] }
  0x29   : > { %1080 = vmatprep.subr.mxu1 %v1986_v0  ;;  %v412_v9 = vld [vmem:[%s2120_s7 + $0x38] sm:$0xff]  ;;  %v410_v11 = vld [vmem:[%s2120_s7 + $0x28] sm:$0xff]  ;;  %v409_v12 = vld [vmem:[%s2120_s7 + $0x20] sm:$0xff] }
  0x2a   : > { %1081 = vmatpush1.msra.mxu1 %v419_v2  ;;  %v408_v13 = vld [vmem:[%s2120_s7 + $0x18] sm:$0xff] }
  0x2b   : > { %1662 = vmatpush3.xpose.msra.mxu0 %v382_v14  ;;  %1082 = vmatprep.subr.mxu1 %v1986_v0  ;;  %v407_v14 = vld [vmem:[%s2120_s7 + $0x10] sm:$0xff] }
  0x2c   : > { %1663 = vmatprep.subr.mxu0 %v397_v15  ;;  %1083 = vmatpush1.msra.mxu1 %v418_v3  ;;  %v406_v15 = vld [vmem:[%s2120_s7 + $0x8] sm:$0xff] }
  0x2d   : > { %1084 = vmatprep.subr.mxu1 %v1986_v0 }
  0x2e   : > { %1085 = vmatpush1.msra.mxu1 %v417_v4 }
  0x2f   : > { %1664 = vmatpush3.xpose.msra.mxu0 %v381_v16  ;;  %1086 = vmatprep.subr.mxu1 %v1986_v0  ;;  %v405_v16 = vld [vmem:[%s2120_s7] sm:$0xff] }
  0x30   : > { %1665 = vmatprep.subr.mxu0 %v396_v17  ;;  %1087 = vmatpush1.msra.mxu1 %v416_v5 }
  0x31   : > { %1088 = vmatprep.subr.mxu1 %v1986_v0 }
  0x32   : > { %1089 = vmatpush1.msra.mxu1 %v415_v6 }
  0x33   : > { %1666 = vmatpush3.xpose.msra.mxu0 %v380_v18  ;;  %1090 = vmatprep.subr.mxu1 %v1986_v0  ;;  %v436_v18 = vld [vmem:[%s2120_s7 + $0xf8] sm:$0xff] }
  0x34   : > { %1667 = vmatprep.subr.mxu0 %v395_v19 }
  0x37   : > { %1668 = vmatpush3.xpose.msra.mxu0 %v379_v20  ;;  %v435_v20 = vld [vmem:[%s2120_s7 + $0xf0] sm:$0xff] }
  0x38   : > { %1669 = vmatprep.subr.mxu0 %v394_v21 }
  0x3b   : > { %1670 = vmatpush3.xpose.msra.mxu0 %v378_v22 }
  0x3c   : > { %1671 = vmatprep.subr.mxu0 %v393_v23  ;;  %v434_v23 = vld [vmem:[%s2120_s7 + $0xe8] sm:$0xff] }
  0x3f   : > { %1672 = vmatpush3.xpose.msra.mxu0 %v377_v24 }
  0x40   : > { %1673 = vmatprep.subr.mxu0 %v392_v25  ;;  %v433_v25 = vld [vmem:[%s2120_s7 + $0xe0] sm:$0xff] }
  0x43   : > { %1674 = vmatpush3.xpose.msra.mxu0 %v376_v26 }
  0x44   : > { %1675 = vmatprep.subr.mxu0 %v391_v27 }
  0x47   : > { %1676 = vmatpush3.xpose.msra.mxu0 %v375_v28  ;;  %v432_v28 = vld [vmem:[%s2120_s7 + $0xd8] sm:$0xff] }
  0x48   : > { %1677 = vmatprep.subr.mxu0 %v390_v29 }
  0x4b   : > { %1678 = vmatpush3.xpose.msra.mxu0 %v374_v30  ;;  %v431_v30 = vld [vmem:[%s2120_s7 + $0xd0] sm:$0xff] }
  0x4c   : > { %1679 = vmatprep.subr.mxu0 %v389_v31 }
  0x4f   : > { %1680 = vmatpush3.xpose.msra.mxu0 %v373_v32 }
  0x52   : > { %1682 = vmatmul.mubr.f32.vlgmr.msra.gmra.mxu0 %v341_v7  ;;  %v414_v7 = vld [vmem:[%s2120_s7 + $0x48] sm:$0xff] }
  0x53   : > { %1683 = vmatprep.mubr.f32.mxu0 %v342_v33  ;;  %1091 = vmatpush1.msra.mxu1 %v414_v7 }
  0x54   : > { %1092 = vmatprep.subr.mxu1 %v1986_v0 }
  0x55   : > { %1093 = vmatpush1.msra.mxu1 %v413_v8 }
  0x56   : > { %1684 = vmatmul.mubr.f32.gmra.mxu0 %v342_v33  ;;  %1094 = vmatprep.subr.mxu1 %v1986_v0 }
  0x57   : > { %1685 = vmatprep.mubr.f32.mxu0 %v343_v34  ;;  %1095 = vmatpush1.msra.mxu1 %v412_v9 }
  0x58   : > { %1096 = vmatprep.subr.mxu1 %v1986_v0 }
  0x59   : > { %1097 = vmatpush1.msra.mxu1 %v411_v10 }
  0x5a   : > { %1686 = vmatmul.mubr.f32.gmra.mxu0 %v343_v34  ;;  %1098 = vmatprep.subr.mxu1 %v1986_v0 }
  0x5b   : > { %1687 = vmatprep.mubr.f32.mxu0 %v344_v35  ;;  %1099 = vmatpush1.msra.mxu1 %v410_v11 }
  0x5c   : > { %1100 = vmatprep.subr.mxu1 %v1986_v0 }
  0x5d   : > { %1101 = vmatpush1.msra.mxu1 %v409_v12 }
  0x5e   : > { %1688 = vmatmul.mubr.f32.gmra.mxu0 %v344_v35  ;;  %1102 = vmatprep.subr.mxu1 %v1986_v0  ;;  %v430_v35 = vld [vmem:[%s2120_s7 + $0xc8] sm:$0xff] }
  0x5f   : > { %1689 = vmatprep.mubr.f32.mxu0 %v345_v36  ;;  %1103 = vmatpush1.msra.mxu1 %v408_v13 }
  0x60   : > { %1104 = vmatprep.subr.mxu1 %v1986_v0 }
  0x61   : > { %1105 = vmatpush1.msra.mxu1 %v407_v14 }
  0x62   : > { %1690 = vmatmul.mubr.f32.gmra.mxu0 %v345_v36  ;;  %1106 = vmatprep.subr.mxu1 %v1986_v0 }
  0x63   : > { %1691 = vmatprep.mubr.f32.mxu0 %v346_v37  ;;  %1107 = vmatpush1.msra.mxu1 %v406_v15 }
  0x64   : > { %1108 = vmatprep.subr.mxu1 %v1986_v0 }
  0x65   : > { %1109 = vmatpush1.msra.mxu1 %v405_v16 }
  0x66   : > { %1692 = vmatmul.mubr.f32.gmra.mxu0 %v346_v37  ;;  %1110 = vmatprep.subr.mxu1 %v1986_v0  ;;  %v429_v37 = vld [vmem:[%s2120_s7 + $0xc0] sm:$0xff] }
  0x67   : > { %1693 = vmatprep.mubr.f32.mxu0 %v347_v38  ;;  %1111 = vmatpush2.msra.mxu1 %v436_v18 }
  0x68   : > { %1112 = vmatprep.subr.mxu1 %v1986_v0 }
  0x69   : > { %1113 = vmatpush2.msra.mxu1 %v435_v20 }
  0x6a   : > { %1694 = vmatmul.mubr.f32.gmra.mxu0 %v347_v38  ;;  %1114 = vmatprep.subr.mxu1 %v1986_v0 }
  0x6b   : > { %1695 = vmatprep.mubr.f32.mxu0 %v348_v39  ;;  %1115 = vmatpush2.msra.mxu1 %v434_v23 }
  0x6c   : > { %1116 = vmatprep.subr.mxu1 %v1986_v0 }
  0x6d   : > { %1117 = vmatpush2.msra.mxu1 %v433_v25 }
  0x6e   : > { %1696 = vmatmul.mubr.f32.gmra.mxu0 %v348_v39  ;;  %1118 = vmatprep.subr.mxu1 %v1986_v0 }
  0x6f   : > { %1697 = vmatprep.mubr.f32.mxu0 %v349_v40  ;;  %1119 = vmatpush2.msra.mxu1 %v432_v28 }
  0x70   : > { %1120 = vmatprep.subr.mxu1 %v1986_v0 }
  0x71   : > { %1121 = vmatpush2.msra.mxu1 %v431_v30 }
  0x72   : > { %1698 = vmatmul.mubr.f32.gmra.mxu0 %v349_v40  ;;  %1122 = vmatprep.subr.mxu1 %v1986_v0  ;;  %v428_v40 = vld [vmem:[%s2120_s7 + $0xb8] sm:$0xff] }
  0x73   : > { %1699 = vmatprep.mubr.f32.mxu0 %v350_v41  ;;  %1123 = vmatpush2.msra.mxu1 %v430_v35 }
  0x74   : > { %1124 = vmatprep.subr.mxu1 %v1986_v0 }
  0x75   : > { %1125 = vmatpush2.msra.mxu1 %v429_v37 }
  0x76   : > { %1700 = vmatmul.mubr.f32.gmra.mxu0 %v350_v41  ;;  %1126 = vmatprep.subr.mxu1 %v1986_v0 }
  0x77   : > { %1701 = vmatprep.mubr.f32.mxu0 %v351_v42  ;;  %1127 = vmatpush2.msra.mxu1 %v428_v40 }
  0x78   : > { %1128 = vmatprep.subr.mxu1 %v1986_v0 }
  0x7a   : > { %1702 = vmatmul.mubr.f32.gmra.mxu0 %v351_v42  ;;  %v427_v42 = vld [vmem:[%s2120_s7 + $0xb0] sm:$0xff] }
  0x7b   : > { %1703 = vmatprep.mubr.f32.mxu0 %v352_v43  ;;  %1129 = vmatpush2.msra.mxu1 %v427_v42 }
  0x7c   : > { %1130 = vmatprep.subr.mxu1 %v1986_v0 }
  0x7e   : > { %1704 = vmatmul.mubr.f32.gmra.mxu0 %v352_v43 }
  0x7f   : > { %1705 = vmatprep.mubr.f32.mxu0 %v353_v44 }
  0x82   : > { %1706 = vmatmul.mubr.f32.gmra.mxu0 %v353_v44 }
  0x83   : > { %1707 = vmatprep.mubr.f32.mxu0 %v354_v45 }
  0x86   : > { %1708 = vmatmul.mubr.f32.gmra.mxu0 %v354_v45  ;;  %v426_v45 = vld [vmem:[%s2120_s7 + $0xa8] sm:$0xff] }
  0x87   : > { %1709 = vmatprep.mubr.f32.mxu0 %v355_v46  ;;  %1131 = vmatpush2.msra.mxu1 %v426_v45 }
  0x88   : > { %1132 = vmatprep.subr.mxu1 %v1986_v0 }
  0x8a   : > { %1710 = vmatmul.mubr.f32.gmra.mxu0 %v355_v46 }
  0x8b   : > { %1711 = vmatprep.mubr.f32.mxu0 %v356_v47 }
  0x8e   : > { %1712 = vmatmul.mubr.f32.gmra.mxu0 %v356_v47  ;;  %v425_v47 = vld [vmem:[%s2120_s7 + $0xa0] sm:$0xff] }
  0x8f   : > { %1713 = vmatprep.mubr.f32.mxu0 %v357_v48  ;;  %1133 = vmatpush2.msra.mxu1 %v425_v47 }
  0x90   : > { %1134 = vmatprep.subr.mxu1 %v1986_v0 }
  0x92   : > { %1714 = vmatmul.mubr.f32.gmra.mxu0 %v357_v48 }
  0x93   : > { %1715 = vmatprep.mubr.f32.mxu0 %v358_v49 }
  0x96   : > { %1716 = vmatmul.mubr.f32.gmra.mxu0 %v358_v49 }
  0x97   : > { %1717 = vmatprep.mubr.f32.mxu0 %v359_v50 }
  0x9a   : > { %1718 = vmatmul.mubr.f32.gmra.mxu0 %v359_v50  ;;  %v424_v50 = vld [vmem:[%s2120_s7 + $0x98] sm:$0xff] }
  0x9b   : > { %1719 = vmatprep.mubr.f32.mxu0 %v360_v51  ;;  %1135 = vmatpush2.msra.mxu1 %v424_v50 }
  0x9c   : > { %1136 = vmatprep.subr.mxu1 %v1986_v0 }
  0x9e   : > { %1720 = vmatmul.mubr.f32.gmra.mxu0 %v360_v51 }
  0x9f   : > { %1721 = vmatprep.mubr.f32.mxu0 %v361_v52 }
  0xa2   : > { %1722 = vmatmul.mubr.f32.gmra.mxu0 %v361_v52  ;;  %v423_v52 = vld [vmem:[%s2120_s7 + $0x90] sm:$0xff] }
  0xa3   : > { %1723 = vmatprep.mubr.f32.mxu0 %v362_v53  ;;  %1137 = vmatpush2.msra.mxu1 %v423_v52 }
  0xa4   : > { %1138 = vmatprep.subr.mxu1 %v1986_v0 }
  0xa6   : > { %1724 = vmatmul.mubr.f32.gmra.mxu0 %v362_v53 }
  0xa7   : > { %1725 = vmatprep.mubr.f32.mxu0 %v363_v54 }
  0xaa   : > { %1726 = vmatmul.mubr.f32.gmra.mxu0 %v363_v54 }
  0xab   : > { %1727 = vmatprep.mubr.f32.mxu0 %v364_v55 }
  0xae   : > { %1728 = vmatmul.mubr.f32.gmra.mxu0 %v364_v55  ;;  %v422_v55 = vld [vmem:[%s2120_s7 + $0x88] sm:$0xff] }
  0xaf   : > { %1729 = vmatprep.mubr.f32.mxu0 %v365_v56  ;;  %1139 = vmatpush2.msra.mxu1 %v422_v55 }
  0xb0   : > { %1140 = vmatprep.subr.mxu1 %v1986_v0 }
  0xb2   : > { %1730 = vmatmul.mubr.f32.gmra.mxu0 %v365_v56 }
  0xb3   : > { %1731 = vmatprep.mubr.f32.mxu0 %v366_v57 }
  0xb6   : > { %1732 = vmatmul.mubr.f32.gmra.mxu0 %v366_v57  ;;  %v421_v57 = vld [vmem:[%s2120_s7 + $0x80] sm:$0xff] }
  0xb7   : > { %1733 = vmatprep.mubr.f32.mxu0 %v367_v58  ;;  %1141 = vmatpush2.msra.mxu1 %v421_v57 }
  0xba   : > { %1734 = vmatmul.mubr.f32.gmra.mxu0 %v367_v58 }
  0xbb   : > { %1735 = vmatprep.mubr.f32.mxu0 %v368_v59 }
  0xbe   : > { %1736 = vmatmul.mubr.f32.gmra.mxu0 %v368_v59 }
  0xbf   : > { %1737 = vmatprep.mubr.f32.mxu0 %v369_v60 }
  0xc2   : > { %1738 = vmatmul.mubr.f32.gmra.mxu0 %v369_v60 }
  0xc3   : > { %1739 = vmatprep.mubr.f32.mxu0 %v370_v61 }
  0xc6   : > { %1740 = vmatmul.mubr.f32.gmra.mxu0 %v370_v61 }
  0xc7   : > { %1741 = vmatprep.mubr.f32.mxu0 %v371_v62 }
  0xca   : > { %1742 = vmatmul.mubr.f32.gmra.mxu0 %v371_v62 }
  0xcb   : > { %1743 = vmatprep.mubr.f32.mxu0 %v372_v63 }
  0xce   : > { %1744 = vmatmul.mubr.f32.gmra.mxu0 %v372_v63 }
 0x112   : > { %v2153_v17 = vpop.f32.mrf.mxu0 }
 0x114   : > { %v2157_v19 = vpop.f32.mrf.mxu0 }
 0x115   : > { %v694_v21 = vmax.f32 %v2153_v17, %v2157_v19 }
 0x116   : > { %v2163_v22 = vpop.f32.mrf.mxu0 }
 0x117   : > { %695 = vmax.xlane.f32.xlu0 %v694_v21 }
 0x118   : > { %v2167_v24 = vpop.f32.mrf.mxu0 }
 0x119   : > { %v697_v26 = vmax.f32 %v2163_v22, %v2167_v24 }
 0x11a   : > { %v2173_v27 = vpop.f32.mrf.mxu0 }
 0x11b   : > { %698 = vmax.xlane.f32.xlu0 %v697_v26 }
 0x11c   : > { %v2177_v29 = vpop.f32.mrf.mxu0 }
 0x11d   : > { %v700_v31 = vmax.f32 %v2173_v27, %v2177_v29 }
 0x11e   : > { %v2183_v32 = vpop.f32.mrf.mxu0 }
 0x11f   : > { %701 = vmax.xlane.f32.xlu1 %v700_v31 }
 0x120   : > { %v2186_v33 = vpop.f32.mrf.mxu0 }
 0x121   : > { %v703_v34 = vmax.f32 %v2183_v32, %v2186_v33 }
 0x122   : > { %v2192_v36 = vpop.f32.mrf.mxu0 }
 0x123   : > { %704 = vmax.xlane.f32.xlu1 %v703_v34 }
 0x124   : > { %v2196_v38 = vpop.f32.mrf.mxu0 }
 0x125   : > { %v706_v39 = vmax.f32 %v2192_v36, %v2196_v38 }
 0x126   : > { %v2202_v41 = vpop.f32.mrf.mxu0 }
 0x127   : > { %707 = vmax.xlane.f32.xlu0 %v706_v39 }
 0x128   : > { %v2206_v43 = vpop.f32.mrf.mxu0 }
 0x129   : > { %v709_v44 = vmax.f32 %v2202_v41, %v2206_v43 }
 0x12a   : > { %v2212_v46 = vpop.f32.mrf.mxu0 }
 0x12b   : > { %710 = vmax.xlane.f32.xlu1 %v709_v44 }
 0x12c   : > { %v2216_v48 = vpop.f32.mrf.mxu0 }
 0x12d   : > { %v712_v49 = vmax.f32 %v2212_v46, %v2216_v48 }
 0x12e   : > { %v2222_v51 = vpop.f32.mrf.mxu0 }
 0x12f   : > { %713 = vmax.xlane.f32.xlu0 %v712_v49 }
 0x130   : > { %v2226_v53 = vpop.f32.mrf.mxu0 }
 0x131   : > { %v715_v54 = vmax.f32 %v2222_v51, %v2226_v53 }
 0x132   : > { %v2232_v56 = vpop.f32.mrf.mxu0 }
 0x133   : > { %716 = vmax.xlane.f32.xlu1 %v715_v54 }
 0x134   : > { %v2236_v58 = vpop.f32.mrf.mxu0 }
 0x135   : > { %v718_v59 = vmax.f32 %v2232_v56, %v2236_v58 }
 0x136   : > { %v2240_v60 = vpop.f32.mrf.mxu0 }
 0x137   : > { %719 = vmax.xlane.f32.xlu0 %v718_v59 }
 0x138   : > { %v2242_v61 = vpop.f32.mrf.mxu0 }
 0x139   : > { %v721_v62 = vmax.f32 %v2240_v60, %v2242_v61 }
 0x13a   : > { %v2246_v63 = vpop.f32.mrf.mxu0 }
 0x13b   : > { %722 = vmax.xlane.f32.xlu1 %v721_v62 }
 0x13c   : > { %v2248_v1 = vpop.f32.mrf.mxu0 }
 0x13d   : > { %v724_v0 = vmax.f32 %v2246_v63, %v2248_v1 }
 0x13e   : > { %v2252_v2 = vpop.f32.mrf.mxu0 }
 0x13f   : > { %725 = vmax.xlane.f32.xlu0 %v724_v0 }
 0x140   : > { %v2254_v3 = vpop.f32.mrf.mxu0 }
 0x141   : > { %v727_v4 = vmax.f32 %v2252_v2, %v2254_v3 }
 0x142   : > { %v2258_v5 = vpop.f32.mrf.mxu0 }
 0x143   : > { %728 = vmax.xlane.f32.xlu1 %v727_v4 }
 0x144   : > { %v2260_v6 = vpop.f32.mrf.mxu0 }
 0x145   : > { %v730_v7 = vmax.f32 %v2258_v5, %v2260_v6 }
 0x146   : > { %v2264_v8 = vpop.f32.mrf.mxu0 }
 0x147   : > { %731 = vmax.xlane.f32.xlu0 %v730_v7 }
 0x148   : > { %v2266_v9 = vpop.f32.mrf.mxu0 }
 0x149   : > { %v733_v10 = vmax.f32 %v2264_v8, %v2266_v9 }
 0x14a   : > { %v2270_v11 = vpop.f32.mrf.mxu0 }
 0x14b   : > { %734 = vmax.xlane.f32.xlu1 %v733_v10 }
 0x14c   : > { %v2272_v12 = vpop.f32.mrf.mxu0 }
 0x14d   : > { %v736_v13 = vmax.f32 %v2270_v11, %v2272_v12 }
 0x14e   : > { %v2276_v14 = vpop.f32.mrf.mxu0 }
 0x14f   : > { %737 = vmax.xlane.f32.xlu0 %v736_v13 }
 0x150   : > { %v2278_v15 = vpop.f32.mrf.mxu0 }
 0x151   : > { %v739_v16 = vmax.f32 %v2276_v14, %v2278_v15 }
 0x152   : > { %v2282_v18 = vpop.f32.mrf.mxu0 }
 0x153   : > { %740 = vmax.xlane.f32.xlu1 %v739_v16 }
 0x154   : > { %v2284_v20 = vpop.f32.mrf.mxu0 }
 0x155   : > { %v742_v21 = vmax.f32 %v2282_v18, %v2284_v20 }
 0x156   : > { %v2288_v23 = vpop.f32.mrf.mxu0 }
 0x157   : > { %743 = vmax.xlane.f32.xlu0 %v742_v21 }
 0x158   : > { %v2290_v25 = vpop.f32.mrf.mxu0 }
 0x159   : > { %v745_v26 = vmax.f32 %v2288_v23, %v2290_v25 }
 0x15a   : > { %v2294_v28 = vpop.f32.mrf.mxu0 }
 0x15b   : > { %746 = vmax.xlane.f32.xlu1 %v745_v26 }
 0x15c   : > { %v2296_v30 = vpop.f32.mrf.mxu0 }
 0x15d   : > { %v748_v31 = vmax.f32 %v2294_v28, %v2296_v30 }
 0x15e   : > { %v2300_v34 = vpop.f32.mrf.mxu0 }
 0x15f   : > { %749 = vmax.xlane.f32.xlu0 %v748_v31 }
 0x160   : > { %v2302_v35 = vpop.f32.mrf.mxu0 }
 0x161   : > { %v751_v37 = vmax.f32 %v2300_v34, %v2302_v35 }
 0x162   : > { %v2306_v39 = vpop.f32.mrf.mxu0 }
 0x163   : > { %752 = vmax.xlane.f32.xlu1 %v751_v37 }
 0x164   : > { %v2308_v40 = vpop.f32.mrf.mxu0 }
 0x165   : > { %v754_v42 = vmax.f32 %v2306_v39, %v2308_v40 }
 0x166   : > { %v2312_v44 = vpop.f32.mrf.mxu0 }
 0x167   : > { %755 = vmax.xlane.f32.xlu0 %v754_v42 }
 0x168   : > { %v2314_v45 = vpop.f32.mrf.mxu0 }
 0x169   : > { %v757_v47 = vmax.f32 %v2312_v44, %v2314_v45 }
 0x16a   : > { %v2318_v49 = vpop.f32.mrf.mxu0 }
 0x16b   : > { %758 = vmax.xlane.f32.xlu1 %v757_v47 }
 0x16c   : > { %v2320_v50 = vpop.f32.mrf.mxu0 }
 0x16d   : > { %v760_v52 = vmax.f32 %v2318_v49, %v2320_v50 }
 0x16e   : > { %v2324_v54 = vpop.f32.mrf.mxu0 }
 0x16f   : > { %761 = vmax.xlane.f32.xlu0 %v760_v52 }
 0x170   : > { %v2326_v55 = vpop.f32.mrf.mxu0 }
 0x171   : > { %v763_v57 = vmax.f32 %v2324_v54, %v2326_v55 }
 0x172   : > { %v2330_v59 = vpop.f32.mrf.mxu0 }
 0x173   : > { %764 = vmax.xlane.f32.xlu1 %v763_v57 }
 0x174   : > { %v2332_v62 = vpop.f32.mrf.mxu0 }
 0x175   : > { %v766_v0 = vmax.f32 %v2330_v59, %v2332_v62 }
 0x176   : > { %v2336_v4 = vpop.f32.mrf.mxu0 }
 0x177   : > { %2612 = vst [vmem:[#allocation3_spill] sm:$0xff] %v2336_v4  ;;  %767 = vmax.xlane.f32.xlu0 %v766_v0 }
 0x178   : > { %v2338_v7 = vpop.f32.mrf.mxu0 }
 0x179   : > { %2613 = vst [vmem:[#allocation4_spill] sm:$0xff] %v2338_v7  ;;  %v769_v10 = vmax.f32 %v2336_v4, %v2338_v7 }
 0x17a   : > { %v2342_v13 = vpop.f32.mrf.mxu0 }
 0x17b   : > { %2614 = vst [vmem:[#allocation5_spill] sm:$0xff] %v2342_v13  ;;  %770 = vmax.xlane.f32.xlu1 %v769_v10 }
 0x17c   : > { %v2344_v16 = vpop.f32.mrf.mxu0 }
 0x17d   : > { %2615 = vst [vmem:[#allocation6_spill] sm:$0xff] %v2344_v16  ;;  %v772_v21 = vmax.f32 %v2342_v13, %v2344_v16 }
 0x17e   : > { %v2348_v26 = vpop.f32.mrf.mxu0 }
 0x17f   : > { %2616 = vst [vmem:[#allocation7_spill] sm:$0xff] %v2348_v26  ;;  %773 = vmax.xlane.f32.xlu0 %v772_v21 }
 0x180   : > { %v2350_v31 = vpop.f32.mrf.mxu0 }
 0x181   : > { %2617 = vst [vmem:[#allocation8_spill] sm:$0xff] %v2350_v31  ;;  %v775_v37 = vmax.f32 %v2348_v26, %v2350_v31 }
 0x182   : > { %v2354_v42 = vpop.f32.mrf.mxu0 }
 0x183   : > { %2618 = vst [vmem:[#allocation9_spill] sm:$0xff] %v2354_v42  ;;  %776 = vmax.xlane.f32.xlu1 %v775_v37 }
 0x184   : > { %v2356_v47 = vpop.f32.mrf.mxu0 }
 0x185   : > { %2619 = vst [vmem:[#allocation10_spill] sm:$0xff] %v2356_v47  ;;  %v778_v52 = vmax.f32 %v2354_v42, %v2356_v47 }
 0x186   : > { %v2360_v57 = vpop.f32.mrf.mxu0 }
 0x187   : > { %2620 = vst [vmem:[#allocation11_spill] sm:$0xff] %v2360_v57  ;;  %779 = vmax.xlane.f32.xlu0 %v778_v52 }
 0x188   : > { %v2362_v0 = vpop.f32.mrf.mxu0 }
 0x189   : > { %2621 = vst [vmem:[#allocation12_spill] sm:$0xff] %v2362_v0  ;;  %v781_v10 = vmax.f32 %v2360_v57, %v2362_v0 }
 0x18a   : > { %v2366_v21 = vpop.f32.mrf.mxu0 }
 0x18b   : > { %2622 = vst [vmem:[#allocation13_spill] sm:$0xff] %v2366_v21  ;;  %782 = vmax.xlane.f32.xlu1 %v781_v10 }
 0x18c   : > { %v2368_v31 = vpop.f32.mrf.mxu0 }
 0x18d   : > { %2623 = vst [vmem:[#allocation14_spill] sm:$0xff] %v2368_v31  ;;  %v784_v37 = vmax.f32 %v2366_v21, %v2368_v31 }
 0x18e   : > { %v2372_v26 = vpop.f32.mrf.mxu0 }
 0x18f   : > { %785 = vmax.xlane.f32.xlu0 %v784_v37 }
 0x190   : > { %v2374_v47 = vpop.f32.mrf.mxu0 }
 0x191   : > { %2624 = vst [vmem:[#allocation15_spill] sm:$0xff] %v2374_v47  ;;  %v787_v52 = vmax.f32 %v2372_v26, %v2374_v47 }
 0x193   : > { %788 = vmax.xlane.f32.xlu1 %v787_v52 }
 0x1a0   : > { %v696_v42 = vpop.xlane.xlu0 %695 }
 0x1a1   : > { %v790_v0 = vsub.f32 %v2153_v17, %v696_v42  ;;  %v791_v57 = vsub.f32 %v2157_v19, %v696_v42 }
 0x1a3   : > { %v854_v10 = vmul.f32 1.442695, %v790_v0  ;;  %v856_v16 = vmul.f32 1.442695, %v791_v57 }
 0x1a4   : > { %v699_v13 = vpop.xlane.xlu0 %698 }
 0x1a5   : > { %1770 = vpow2.f32 %v854_v10  ;;  %v792_v31 = vsub.f32 %v2163_v22, %v699_v13  ;;  %v793_v21 = vsub.f32 %v2167_v24, %v699_v13 }
 0x1a6   : > { %1772 = vpow2.f32 %v856_v16 }
 0x1a7   : > { %v858_v37 = vmul.f32 1.442695, %v792_v31  ;;  %v860_v7 = vmul.f32 1.442695, %v793_v21 }
 0x1a8   : > { %v702_v4 = vpop.xlane.xlu1 %701 }
 0x1a9   : > { %1774 = vpow2.f32 %v858_v37  ;;  %v794_v52 = vsub.f32 %v2173_v27, %v702_v4  ;;  %v795_v47 = vsub.f32 %v2177_v29, %v702_v4 }
 0x1aa   : > { %1776 = vpow2.f32 %v860_v7 }
 0x1ab   : > { %v862_v17 = vmul.f32 1.442695, %v794_v52  ;;  %v864_v19 = vmul.f32 1.442695, %v795_v47 }
 0x1ac   : > { %v705_v42 = vpop.xlane.xlu1 %704 }
 0x1ad   : > { %1778 = vpow2.f32 %v862_v17  ;;  %v796_v57 = vsub.f32 %v2183_v32, %v705_v42  ;;  %v797_v22 = vsub.f32 %v2186_v33, %v705_v42 }
 0x1ae   : > { %1780 = vpow2.f32 %v864_v19 }
 0x1af   : > { %v866_v24 = vmul.f32 1.442695, %v796_v57  ;;  %v868_v13 = vmul.f32 1.442695, %v797_v22 }
 0x1b0   : > { %v708_v16 = vpop.xlane.xlu0 %707 }
 0x1b1   : > { %1782 = vpow2.f32 %v866_v24  ;;  %v798_v31 = vsub.f32 %v2192_v36, %v708_v16  ;;  %v799_v27 = vsub.f32 %v2196_v38, %v708_v16 }
 0x1b2   : > { %v1771_v0 = vpop.eup %1770  ;;  %1784 = vpow2.f32 %v868_v13 }
 0x1b3   : > { %v1773_v29 = vpop.eup %1772  ;;  %v870_v4 = vmul.f32 1.442695, %v798_v31  ;;  %v872_v7 = vmul.f32 1.442695, %v799_v27 }
 0x1b4   : > { %1142 = vmatprep.mubr.f32.mxu1 %v1773_v29  ;;  %v711_v47 = vpop.xlane.xlu1 %710  ;;  %v982_v21 = vadd.f32 %v1773_v29, %v1771_v0 }
 0x1b5   : > { %1786 = vpow2.f32 %v870_v4  ;;  %1143 = vmatmul.mubr.f32.vlgmr.msra.gmra.mxu1 %v1771_v0  ;;  %v800_v32 = vsub.f32 %v2202_v41, %v711_v47  ;;  %v801_v33 = vsub.f32 %v2206_v43, %v711_v47 }
 0x1b6   : > { %v1775_v10 = vpop.eup %1774  ;;  %1788 = vpow2.f32 %v872_v7  ;;  %983 = vadd.xlane.f32.xlu0 %v982_v21 }
 0x1b7   : > { %v1777_v36 = vpop.eup %1776  ;;  %v874_v37 = vmul.f32 1.442695, %v800_v32  ;;  %v876_v38 = vmul.f32 1.442695, %v801_v33 }
 0x1b8   : > { %1147 = vmatprep.mubr.f32.mxu1 %v1777_v36  ;;  %v714_v52 = vpop.xlane.xlu0 %713  ;;  %v985_v17 = vadd.f32 %v1777_v36, %v1775_v10 }
 0x1b9   : > { %1790 = vpow2.f32 %v874_v37  ;;  %1148 = vmatmul.mubr.f32.gmra.mxu1 %v1775_v10  ;;  %v802_v19 = vsub.f32 %v2212_v46, %v714_v52  ;;  %v803_v42 = vsub.f32 %v2216_v48, %v714_v52 }
 0x1ba   : > { %v1779_v57 = vpop.eup %1778  ;;  %1792 = vpow2.f32 %v876_v38  ;;  %986 = vadd.xlane.f32.xlu1 %v985_v17 }
 0x1bb   : > { %v1781_v41 = vpop.eup %1780  ;;  %v878_v43 = vmul.f32 1.442695, %v802_v19  ;;  %v880_v22 = vmul.f32 1.442695, %v803_v42 }
 0x1bc   : > { %1152 = vmatprep.mubr.f32.mxu1 %v1781_v41  ;;  %v717_v24 = vpop.xlane.xlu1 %716  ;;  %v988_v13 = vadd.f32 %v1781_v41, %v1779_v57 }
 0x1bd   : > { %1794 = vpow2.f32 %v878_v43  ;;  %1153 = vmatmul.mubr.f32.gmra.mxu1 %v1779_v57  ;;  %v804_v16 = vsub.f32 %v2222_v51, %v717_v24  ;;  %v805_v31 = vsub.f32 %v2226_v53, %v717_v24 }
 0x1be   : > { %v1783_v27 = vpop.eup %1782  ;;  %1796 = vpow2.f32 %v880_v22  ;;  %989 = vadd.xlane.f32.xlu0 %v988_v13 }
 0x1bf   : > { %v1785_v46 = vpop.eup %1784  ;;  %v882_v48 = vmul.f32 1.442695, %v804_v16  ;;  %v884_v0 = vmul.f32 1.442695, %v805_v31 }
 0x1c0   : > { %1157 = vmatprep.mubr.f32.mxu1 %v1785_v46  ;;  %v720_v29 = vpop.xlane.xlu0 %719  ;;  %v991_v4 = vadd.f32 %v1785_v46, %v1783_v27 }
 0x1c1   : > { %1798 = vpow2.f32 %v882_v48  ;;  %1158 = vmatmul.mubr.f32.gmra.mxu1 %v1783_v27  ;;  %v806_v7 = vsub.f32 %v2232_v56, %v720_v29  ;;  %v807_v47 = vsub.f32 %v2236_v58, %v720_v29 }
 0x1c2   : > { %v1787_v21 = vpop.eup %1786  ;;  %1800 = vpow2.f32 %v884_v0  ;;  %992 = vadd.xlane.f32.xlu1 %v991_v4 }
 0x1c3   : > { %v1789_v51 = vpop.eup %1788  ;;  %v886_v53 = vmul.f32 1.442695, %v806_v7  ;;  %v888_v32 = vmul.f32 1.442695, %v807_v47 }
 0x1c4   : > { %1162 = vmatprep.mubr.f32.mxu1 %v1789_v51  ;;  %v723_v33 = vpop.xlane.xlu1 %722  ;;  %v994_v10 = vadd.f32 %v1789_v51, %v1787_v21 }
 0x1c5   : > { %1802 = vpow2.f32 %v886_v53  ;;  %1163 = vmatmul.mubr.f32.gmra.mxu1 %v1787_v21  ;;  %v808_v36 = vsub.f32 %v2240_v60, %v723_v33  ;;  %v809_v37 = vsub.f32 %v2242_v61, %v723_v33 }
 0x1c6   : > { %v1791_v38 = vpop.eup %1790  ;;  %1804 = vpow2.f32 %v888_v32  ;;  %995 = vadd.xlane.f32.xlu0 %v994_v10 }
 0x1c7   : > { %v1793_v56 = vpop.eup %1792  ;;  %v890_v58 = vmul.f32 1.442695, %v808_v36  ;;  %v892_v52 = vmul.f32 1.442695, %v809_v37 }
 0x1c8   : > { %1167 = vmatprep.mubr.f32.mxu1 %v1793_v56  ;;  %v726_v17 = vpop.xlane.xlu0 %725  ;;  %v997_v19 = vadd.f32 %v1793_v56, %v1791_v38 }
 0x1c9   : > { %1806 = vpow2.f32 %v890_v58  ;;  %1168 = vmatmul.mubr.f32.gmra.mxu1 %v1791_v38  ;;  %v810_v42 = vsub.f32 %v2246_v63, %v726_v17  ;;  %v811_v57 = vsub.f32 %v2248_v1, %v726_v17 }
 0x1ca   : > { %v1795_v41 = vpop.eup %1794  ;;  %1808 = vpow2.f32 %v892_v52  ;;  %998 = vadd.xlane.f32.xlu1 %v997_v19 }
 0x1cb   : > { %v1797_v60 = vpop.eup %1796  ;;  %v894_v61 = vmul.f32 1.442695, %v810_v42  ;;  %v896_v43 = vmul.f32 1.442695, %v811_v57 }
 0x1cc   : > { %1172 = vmatprep.mubr.f32.mxu1 %v1797_v60  ;;  %v729_v22 = vpop.xlane.xlu1 %728  ;;  %v1000_v24 = vadd.f32 %v1797_v60, %v1795_v41 }
 0x1cd   : > { %1810 = vpow2.f32 %v894_v61  ;;  %1173 = vmatmul.mubr.f32.gmra.mxu1 %v1795_v41  ;;  %v812_v13 = vsub.f32 %v2252_v2, %v729_v22  ;;  %v813_v16 = vsub.f32 %v2254_v3, %v729_v22 }
 0x1ce   : > { %v1799_v31 = vpop.eup %1798  ;;  %1812 = vpow2.f32 %v896_v43  ;;  %1001 = vadd.xlane.f32.xlu0 %v1000_v24 }
 0x1cf   : > { %v1801_v63 = vpop.eup %1800  ;;  %v898_v1 = vmul.f32 1.442695, %v812_v13  ;;  %v900_v27 = vmul.f32 1.442695, %v813_v16 }
 0x1d0   : > { %1177 = vmatprep.mubr.f32.mxu1 %v1801_v63  ;;  %v732_v46 = vpop.xlane.xlu0 %731  ;;  %v1003_v48 = vadd.f32 %v1801_v63, %v1799_v31 }
 0x1d1   : > { %1814 = vpow2.f32 %v898_v1  ;;  %1178 = vmatmul.mubr.f32.gmra.mxu1 %v1799_v31  ;;  %v814_v0 = vsub.f32 %v2258_v5, %v732_v46  ;;  %v815_v29 = vsub.f32 %v2260_v6, %v732_v46 }
 0x1d2   : > { %v1803_v4 = vpop.eup %1802  ;;  %1816 = vpow2.f32 %v900_v27  ;;  %1004 = vadd.xlane.f32.xlu1 %v1003_v48 }
 0x1d3   : > { %v1805_v2 = vpop.eup %1804  ;;  %v902_v3 = vmul.f32 1.442695, %v814_v0  ;;  %v904_v7 = vmul.f32 1.442695, %v815_v29 }
 0x1d4   : > { %1182 = vmatprep.mubr.f32.mxu1 %v1805_v2  ;;  %v735_v47 = vpop.xlane.xlu1 %734  ;;  %v1006_v21 = vadd.f32 %v1805_v2, %v1803_v4 }
 0x1d5   : > { %1818 = vpow2.f32 %v902_v3  ;;  %1183 = vmatmul.mubr.f32.gmra.mxu1 %v1803_v4  ;;  %v816_v51 = vsub.f32 %v2264_v8, %v735_v47  ;;  %v817_v53 = vsub.f32 %v2266_v9, %v735_v47 }
 0x1d6   : > { %v1807_v32 = vpop.eup %1806  ;;  %1820 = vpow2.f32 %v904_v7  ;;  %1007 = vadd.xlane.f32.xlu0 %v1006_v21 }
 0x1d7   : > { %v1809_v5 = vpop.eup %1808  ;;  %v906_v6 = vmul.f32 1.442695, %v816_v51  ;;  %v908_v33 = vmul.f32 1.442695, %v817_v53 }
 0x1d8   : > { %1187 = vmatprep.mubr.f32.mxu1 %v1809_v5  ;;  %v738_v10 = vpop.xlane.xlu0 %737  ;;  %v1009_v36 = vadd.f32 %v1809_v5, %v1807_v32 }
 0x1d9   : > { %1822 = vpow2.f32 %v906_v6  ;;  %1188 = vmatmul.mubr.f32.gmra.mxu1 %v1807_v32  ;;  %v818_v37 = vsub.f32 %v2270_v11, %v738_v10  ;;  %v819_v38 = vsub.f32 %v2272_v12, %v738_v10 }
 0x1da   : > { %v1811_v56 = vpop.eup %1810  ;;  %1824 = vpow2.f32 %v908_v33  ;;  %1010 = vadd.xlane.f32.xlu1 %v1009_v36 }
 0x1db   : > { %v1813_v8 = vpop.eup %1812  ;;  %v910_v9 = vmul.f32 1.442695, %v818_v37  ;;  %v912_v58 = vmul.f32 1.442695, %v819_v38 }
 0x1dc   : > { %1192 = vmatprep.mubr.f32.mxu1 %v1813_v8  ;;  %v741_v52 = vpop.xlane.xlu1 %740  ;;  %v1012_v17 = vadd.f32 %v1813_v8, %v1811_v56 }
 0x1dd   : > { %1826 = vpow2.f32 %v910_v9  ;;  %1193 = vmatmul.mubr.f32.gmra.mxu1 %v1811_v56  ;;  %v820_v19 = vsub.f32 %v2276_v14, %v741_v52  ;;  %v821_v42 = vsub.f32 %v2278_v15, %v741_v52 }
 0x1de   : > { %v1815_v57 = vpop.eup %1814  ;;  %1828 = vpow2.f32 %v912_v58  ;;  %1013 = vadd.xlane.f32.xlu0 %v1012_v17 }
 0x1df   : > { %v1817_v11 = vpop.eup %1816  ;;  %v914_v12 = vmul.f32 1.442695, %v820_v19  ;;  %v916_v41 = vmul.f32 1.442695, %v821_v42 }
 0x1e0   : > { %1197 = vmatprep.mubr.f32.mxu1 %v1817_v11  ;;  %v744_v60 = vpop.xlane.xlu0 %743  ;;  %v1015_v61 = vadd.f32 %v1817_v11, %v1815_v57 }
 0x1e1   : > { %1830 = vpow2.f32 %v914_v12  ;;  %1198 = vmatmul.mubr.f32.gmra.mxu1 %v1815_v57  ;;  %v822_v43 = vsub.f32 %v2282_v18, %v744_v60  ;;  %v823_v22 = vsub.f32 %v2284_v20, %v744_v60 }
 0x1e2   : > { %v1819_v24 = vpop.eup %1818  ;;  %1832 = vpow2.f32 %v916_v41  ;;  %1016 = vadd.xlane.f32.xlu1 %v1015_v61 }
 0x1e3   : > { %v1821_v14 = vpop.eup %1820  ;;  %v918_v15 = vmul.f32 1.442695, %v822_v43  ;;  %v920_v13 = vmul.f32 1.442695, %v823_v22 }
 0x1e4   : > { %1202 = vmatprep.mubr.f32.mxu1 %v1821_v14  ;;  %v747_v16 = vpop.xlane.xlu1 %746  ;;  %v1018_v31 = vadd.f32 %v1821_v14, %v1819_v24 }
 0x1e5   : > { %1834 = vpow2.f32 %v918_v15  ;;  %1203 = vmatmul.mubr.f32.gmra.mxu1 %v1819_v24  ;;  %v824_v63 = vsub.f32 %v2288_v23, %v747_v16  ;;  %v825_v1 = vsub.f32 %v2290_v25, %v747_v16 }
 0x1e6   : > { %v1823_v27 = vpop.eup %1822  ;;  %1836 = vpow2.f32 %v920_v13  ;;  %1019 = vadd.xlane.f32.xlu0 %v1018_v31 }
 0x1e7   : > { %v1825_v18 = vpop.eup %1824  ;;  %v922_v20 = vmul.f32 1.442695, %v824_v63  ;;  %v924_v46 = vmul.f32 1.442695, %v825_v1 }
 0x1e8   : > { %1207 = vmatprep.mubr.f32.mxu1 %v1825_v18  ;;  %v750_v48 = vpop.xlane.xlu0 %749  ;;  %v1021_v0 = vadd.f32 %v1825_v18, %v1823_v27  ;;  %v2625_v18 = vld [vmem:[#allocation3_spill] sm:$0xff] }
 0x1e9   : > { %1838 = vpow2.f32 %v922_v20  ;;  %1208 = vmatmul.mubr.f32.gmra.mxu1 %v1823_v27  ;;  %v826_v29 = vsub.f32 %v2294_v28, %v750_v48  ;;  %v827_v4 = vsub.f32 %v2296_v30, %v750_v48 }
 0x1ea   : > { %v1827_v2 = vpop.eup %1826  ;;  %1840 = vpow2.f32 %v924_v46  ;;  %1022 = vadd.xlane.f32.xlu1 %v1021_v0  ;;  %v2626_v46 = vld [vmem:[#allocation4_spill] sm:$0xff] }
 0x1eb   : > { %v1829_v23 = vpop.eup %1828  ;;  %v926_v25 = vmul.f32 1.442695, %v826_v29  ;;  %v928_v3 = vmul.f32 1.442695, %v827_v4 }
 0x1ec   : > { %1212 = vmatprep.mubr.f32.mxu1 %v1829_v23  ;;  %v753_v7 = vpop.xlane.xlu1 %752  ;;  %v1024_v47 = vadd.f32 %v1829_v23, %v1827_v2  ;;  %v2627_v23 = vld [vmem:[#allocation5_spill] sm:$0xff] }
 0x1ed   : > { %1842 = vpow2.f32 %v926_v25  ;;  %1213 = vmatmul.mubr.f32.gmra.mxu1 %v1827_v2  ;;  %v828_v21 = vsub.f32 %v2300_v34, %v753_v7  ;;  %v829_v51 = vsub.f32 %v2302_v35, %v753_v7 }
 0x1ee   : > { %v1831_v53 = vpop.eup %1830  ;;  %1844 = vpow2.f32 %v928_v3  ;;  %1025 = vadd.xlane.f32.xlu0 %v1024_v47  ;;  %v2628_v3 = vld [vmem:[#allocation6_spill] sm:$0xff] }
 0x1ef   : > { %v1833_v28 = vpop.eup %1832  ;;  %v930_v30 = vmul.f32 1.442695, %v828_v21  ;;  %v932_v32 = vmul.f32 1.442695, %v829_v51 }
 0x1f0   : > { %1217 = vmatprep.mubr.f32.mxu1 %v1833_v28  ;;  %v756_v5 = vpop.xlane.xlu0 %755  ;;  %v1027_v6 = vadd.f32 %v1833_v28, %v1831_v53 }
 0x1f1   : > { %1846 = vpow2.f32 %v930_v30  ;;  %1218 = vmatmul.mubr.f32.gmra.mxu1 %v1831_v53  ;;  %v830_v33 = vsub.f32 %v2306_v39, %v756_v5  ;;  %v831_v10 = vsub.f32 %v2308_v40, %v756_v5 }
 0x1f2   : > { %v1835_v36 = vpop.eup %1834  ;;  %1848 = vpow2.f32 %v932_v32  ;;  %1028 = vadd.xlane.f32.xlu1 %v1027_v6  ;;  %v2629_v32 = vld [vmem:[#allocation7_spill] sm:$0xff]  ;;  %v2630_v6 = vld [vmem:[#allocation8_spill] sm:$0xff] }
 0x1f3   : > { %v1837_v34 = vpop.eup %1836  ;;  %v934_v35 = vmul.f32 1.442695, %v830_v33  ;;  %v936_v37 = vmul.f32 1.442695, %v831_v10 }
 0x1f4   : > { %1222 = vmatprep.mubr.f32.mxu1 %v1837_v34  ;;  %v759_v38 = vpop.xlane.xlu1 %758  ;;  %v1030_v56 = vadd.f32 %v1837_v34, %v1835_v36 }
 0x1f5   : > { %1850 = vpow2.f32 %v934_v35  ;;  %1223 = vmatmul.mubr.f32.gmra.mxu1 %v1835_v36  ;;  %v832_v8 = vsub.f32 %v2312_v44, %v759_v38  ;;  %v833_v9 = vsub.f32 %v2314_v45, %v759_v38 }
 0x1f6   : > { %v1839_v58 = vpop.eup %1838  ;;  %1852 = vpow2.f32 %v936_v37  ;;  %1031 = vadd.xlane.f32.xlu0 %v1030_v56  ;;  %v2631_v56 = vld [vmem:[#allocation9_spill] sm:$0xff] }
 0x1f7   : > { %v1841_v39 = vpop.eup %1840  ;;  %v938_v40 = vmul.f32 1.442695, %v832_v8  ;;  %v940_v52 = vmul.f32 1.442695, %v833_v9  ;;  %v2632_v9 = vld [vmem:[#allocation10_spill] sm:$0xff] }
 0x1f8   : > { %1227 = vmatprep.mubr.f32.mxu1 %v1841_v39  ;;  %v762_v17 = vpop.xlane.xlu0 %761  ;;  %v1033_v19 = vadd.f32 %v1841_v39, %v1839_v58 }
 0x1f9   : > { %1854 = vpow2.f32 %v938_v40  ;;  %1228 = vmatmul.mubr.f32.gmra.mxu1 %v1839_v58  ;;  %v834_v42 = vsub.f32 %v2318_v49, %v762_v17  ;;  %v835_v57 = vsub.f32 %v2320_v50, %v762_v17 }
 0x1fa   : > { %v1843_v11 = vpop.eup %1842  ;;  %1856 = vpow2.f32 %v940_v52  ;;  %1034 = vadd.xlane.f32.xlu1 %v1033_v19 }
 0x1fb   : > { %v1845_v44 = vpop.eup %1844  ;;  %v942_v45 = vmul.f32 1.442695, %v834_v42  ;;  %v944_v12 = vmul.f32 1.442695, %v835_v57  ;;  %v2633_v57 = vld [vmem:[#allocation11_spill] sm:$0xff] }
 0x1fc   : > { %1232 = vmatprep.mubr.f32.mxu1 %v1845_v44  ;;  %v765_v41 = vpop.xlane.xlu1 %764  ;;  %v1036_v60 = vadd.f32 %v1845_v44, %v1843_v11  ;;  %v2634_v44 = vld [vmem:[#allocation12_spill] sm:$0xff] }
 0x1fd   : > { %1858 = vpow2.f32 %v942_v45  ;;  %1233 = vmatmul.mubr.f32.gmra.mxu1 %v1843_v11  ;;  %v836_v61 = vsub.f32 %v2324_v54, %v765_v41  ;;  %v837_v43 = vsub.f32 %v2326_v55, %v765_v41 }
 0x1fe   : > { %v1847_v22 = vpop.eup %1846  ;;  %1860 = vpow2.f32 %v944_v12  ;;  %1037 = vadd.xlane.f32.xlu0 %v1036_v60 }
 0x1ff   : > { %v1849_v49 = vpop.eup %1848  ;;  %v946_v50 = vmul.f32 1.442695, %v836_v61  ;;  %v948_v24 = vmul.f32 1.442695, %v837_v43 }
 0x200   : > { %1237 = vmatprep.mubr.f32.mxu1 %v1849_v49  ;;  %v768_v14 = vpop.xlane.xlu0 %767  ;;  %v1039_v15 = vadd.f32 %v1849_v49, %v1847_v22  ;;  %v2635_v49 = vld [vmem:[#allocation13_spill] sm:$0xff] }
 0x201   : > { %1862 = vpow2.f32 %v946_v50  ;;  %1238 = vmatmul.mubr.f32.gmra.mxu1 %v1847_v22  ;;  %v838_v13 = vsub.f32 %v2330_v59, %v768_v14  ;;  %v839_v16 = vsub.f32 %v2332_v62, %v768_v14 }
 0x202   : > { %v1851_v31 = vpop.eup %1850  ;;  %1864 = vpow2.f32 %v948_v24  ;;  %1040 = vadd.xlane.f32.xlu1 %v1039_v15  ;;  %v2636_v24 = vld [vmem:[#allocation14_spill] sm:$0xff] }
 0x203   : > { %v1853_v54 = vpop.eup %1852  ;;  %v950_v55 = vmul.f32 1.442695, %v838_v13  ;;  %v952_v63 = vmul.f32 1.442695, %v839_v16 }
 0x204   : > { %1242 = vmatprep.mubr.f32.mxu1 %v1853_v54  ;;  %v771_v1 = vpop.xlane.xlu1 %770  ;;  %v1042_v27 = vadd.f32 %v1853_v54, %v1851_v31 }
 0x205   : > { %1866 = vpow2.f32 %v950_v55  ;;  %1243 = vmatmul.mubr.f32.gmra.mxu1 %v1851_v31  ;;  %v840_v20 = vsub.f32 %v2625_v18, %v771_v1  ;;  %v841_v48 = vsub.f32 %v2626_v46, %v771_v1  ;;  %v2637_v1 = vld [vmem:[#allocation15_spill] sm:$0xff] }
 0x206   : > { %v1855_v0 = vpop.eup %1854  ;;  %1868 = vpow2.f32 %v952_v63  ;;  %1043 = vadd.xlane.f32.xlu0 %v1042_v27 }
 0x207   : > { %v1857_v59 = vpop.eup %1856  ;;  %v954_v62 = vmul.f32 1.442695, %v840_v20  ;;  %v956_v29 = vmul.f32 1.442695, %v841_v48 }
 0x208   : > { %1247 = vmatprep.mubr.f32.mxu1 %v1857_v59  ;;  %v774_v4 = vpop.xlane.xlu0 %773  ;;  %v1045_v2 = vadd.f32 %v1857_v59, %v1855_v0 }
 0x209   : > { %1870 = vpow2.f32 %v954_v62  ;;  %1248 = vmatmul.mubr.f32.gmra.mxu1 %v1855_v0  ;;  %v842_v25 = vsub.f32 %v2627_v23, %v774_v4  ;;  %v843_v7 = vsub.f32 %v2628_v3, %v774_v4 }
 0x20a   : > { %v1859_v47 = vpop.eup %1858  ;;  %1872 = vpow2.f32 %v956_v29  ;;  %1046 = vadd.xlane.f32.xlu1 %v1045_v2 }
 0x20b   : > { %v1861_v21 = vpop.eup %1860  ;;  %v958_v51 = vmul.f32 1.442695, %v842_v25  ;;  %v960_v53 = vmul.f32 1.442695, %v843_v7 }
 0x20c   : > { %1252 = vmatprep.mubr.f32.mxu1 %v1861_v21  ;;  %v777_v28 = vpop.xlane.xlu1 %776  ;;  %v1048_v30 = vadd.f32 %v1861_v21, %v1859_v47 }
 0x20d   : > { %1874 = vpow2.f32 %v958_v51  ;;  %1253 = vmatmul.mubr.f32.gmra.mxu1 %v1859_v47  ;;  %v844_v5 = vsub.f32 %v2629_v32, %v777_v28  ;;  %v845_v33 = vsub.f32 %v2630_v6, %v777_v28  ;;  %v2442_v6 = vstv %s1303_s8 }
 0x20e   : > { %v1863_v10 = vpop.eup %1862  ;;  %1876 = vpow2.f32 %v960_v53  ;;  %1049 = vadd.xlane.f32.xlu0 %v1048_v30 }
 0x20f   : > { %v1865_v36 = vpop.eup %1864  ;;  %v962_v34 = vmul.f32 1.442695, %v844_v5  ;;  %v964_v35 = vmul.f32 1.442695, %v845_v33 }
 0x210   : > { %1257 = vmatprep.mubr.f32.mxu1 %v1865_v36  ;;  %v780_v37 = vpop.xlane.xlu0 %779  ;;  %v1051_v38 = vadd.f32 %v1865_v36, %v1863_v10 }
 0x211   : > { %1878 = vpow2.f32 %v962_v34  ;;  %1258 = vmatmul.mubr.f32.gmra.mxu1 %v1863_v10  ;;  %v846_v8 = vsub.f32 %v2631_v56, %v780_v37  ;;  %v847_v58 = vsub.f32 %v2632_v9, %v780_v37 }
 0x212   : > { %v1867_v39 = vpop.eup %1866  ;;  %1880 = vpow2.f32 %v964_v35  ;;  %1052 = vadd.xlane.f32.xlu1 %v1051_v38  ;;  %v1401_v35 = vld [vmem:[%s2448_s11] sm:$0xff] }
 0x213   : > { %v1869_v40 = vpop.eup %1868  ;;  %v966_v52 = vmul.f32 1.442695, %v846_v8  ;;  %v968_v17 = vmul.f32 1.442695, %v847_v58 }
 0x214   : > { %1262 = vmatprep.mubr.f32.mxu1 %v1869_v40  ;;  %v783_v19 = vpop.xlane.xlu1 %782  ;;  %v1054_v42 = vadd.f32 %v1869_v40, %v1867_v39  ;;  %v1402_v40 = vld [vmem:[%s2448_s11 + $0x8] sm:$0xff] }
 0x215   : > { %1882 = vpow2.f32 %v966_v52  ;;  %1263 = vmatmul.mubr.f32.gmra.mxu1 %v1867_v39  ;;  %v848_v11 = vsub.f32 %v2633_v57, %v783_v19  ;;  %v849_v45 = vsub.f32 %v2634_v44, %v783_v19 }
 0x216   : > { %v1871_v12 = vpop.eup %1870  ;;  %1884 = vpow2.f32 %v968_v17  ;;  %1055 = vadd.xlane.f32.xlu0 %v1054_v42 }
 0x217   : > { %v1873_v41 = vpop.eup %1872  ;;  %v970_v60 = vmul.f32 1.442695, %v848_v11  ;;  %v972_v61 = vmul.f32 1.442695, %v849_v45  ;;  %v1403_v45 = vld [vmem:[%s2448_s11 + $0x10] sm:$0xff] }
 0x218   : > { %1267 = vmatprep.mubr.f32.mxu1 %v1873_v41  ;;  %v786_v43 = vpop.xlane.xlu0 %785  ;;  %v1057_v22 = vadd.f32 %v1873_v41, %v1871_v12 }
 0x219   : > { %1886 = vpow2.f32 %v970_v60  ;;  %1268 = vmatmul.mubr.f32.gmra.mxu1 %v1871_v12  ;;  %v850_v50 = vsub.f32 %v2635_v49, %v786_v43  ;;  %v851_v14 = vsub.f32 %v2636_v24, %v786_v43 }
 0x21a   : > { %v1875_v15 = vpop.eup %1874  ;;  %1888 = vpow2.f32 %v972_v61  ;;  %1058 = vadd.xlane.f32.xlu1 %v1057_v22 }
 0x21b   : > { %v1877_v13 = vpop.eup %1876  ;;  %v974_v16 = vmul.f32 1.442695, %v850_v50  ;;  %v976_v31 = vmul.f32 1.442695, %v851_v14  ;;  %v1404_v50 = vld [vmem:[%s2448_s11 + $0x18] sm:$0xff] }
 0x21c   : > { %1272 = vmatprep.mubr.f32.mxu1 %v1877_v13  ;;  %v789_v54 = vpop.xlane.xlu1 %788  ;;  %v1060_v55 = vadd.f32 %v1877_v13, %v1875_v15 }
 0x21d   : > { %1890 = vpow2.f32 %v974_v16  ;;  %1273 = vmatmul.mubr.f32.gmra.mxu1 %v1875_v15  ;;  %v852_v63 = vsub.f32 %v2372_v26, %v789_v54  ;;  %v853_v27 = vsub.f32 %v2637_v1, %v789_v54 }
 0x21e   : > { %v1879_v18 = vpop.eup %1878  ;;  %1892 = vpow2.f32 %v976_v31  ;;  %1061 = vadd.xlane.f32.xlu0 %v1060_v55  ;;  %v1405_v55 = vld [vmem:[%s2448_s11 + $0x20] sm:$0xff] }
 0x21f   : > { %v1881_v20 = vpop.eup %1880  ;;  %v978_v46 = vmul.f32 1.442695, %v852_v63  ;;  %v980_v48 = vmul.f32 1.442695, %v853_v27 }
 0x220   : > { %1277 = vmatprep.mubr.f32.mxu1 %v1881_v20  ;;  %v1063_v0 = vadd.f32 %v1881_v20, %v1879_v18 }
 0x221   : > { %1894 = vpow2.f32 %v978_v46  ;;  %1278 = vmatmul.mubr.f32.gmra.mxu1 %v1879_v18 }
 0x222   : > { %v1883_v59 = vpop.eup %1882  ;;  %1896 = vpow2.f32 %v980_v48  ;;  %1064 = vadd.xlane.f32.xlu1 %v1063_v0  ;;  %v1406_v0 = vld [vmem:[%s2448_s11 + $0x28] sm:$0xff] }
 0x223   : > { %v1885_v62 = vpop.eup %1884 }
 0x224   : > { %1282 = vmatprep.mubr.f32.mxu1 %v1885_v62  ;;  %v1066_v29 = vadd.f32 %v1885_v62, %v1883_v59 }
 0x225   : > { %1283 = vmatmul.mubr.f32.gmra.mxu1 %v1883_v59 }
 0x226   : > { %v1887_v26 = vpop.eup %1886  ;;  %1067 = vadd.xlane.f32.xlu0 %v1066_v29 }
 0x227   : > { %v1889_v4 = vpop.eup %1888 }
 0x228   : > { %1287 = vmatprep.mubr.f32.mxu1 %v1889_v4  ;;  %v1069_v2 = vadd.f32 %v1889_v4, %v1887_v26 }
 0x229   : > { %1288 = vmatmul.mubr.f32.gmra.mxu1 %v1887_v26 }
 0x22a   : > { %v1891_v23 = vpop.eup %1890  ;;  %1070 = vadd.xlane.f32.xlu1 %v1069_v2 }
 0x22b   : > { %v1893_v25 = vpop.eup %1892 }
 0x22c   : > { %1292 = vmatprep.mubr.f32.mxu1 %v1893_v25  ;;  %v1072_v3 = vadd.f32 %v1893_v25, %v1891_v23  ;;  %v1407_v25 = vld [vmem:[%s2448_s11 + $0x30] sm:$0xff] }
 0x22d   : > { %1293 = vmatmul.mubr.f32.gmra.mxu1 %v1891_v23 }
 0x22e   : > { %v1895_v7 = vpop.eup %1894  ;;  %1073 = vadd.xlane.f32.xlu0 %v1072_v3 }
 0x22f   : > { %v1897_v47 = vpop.eup %1896 }
 0x230   : > { %1297 = vmatprep.mubr.f32.mxu1 %v1897_v47  ;;  %v1075_v21 = vadd.f32 %v1897_v47, %v1895_v7 }
 0x231   : > { %1298 = vmatmul.mubr.f32.gmra.mxu1 %v1895_v7 }
 0x232   : > { %1076 = vadd.xlane.f32.xlu1 %v1075_v21 }
 0x23f   : > { %v984_v51 = vpop.xlane.xlu0 %983 }
 0x240   : > { %1898 = vrcp.f32 %v984_v51 }
 0x243   : > { %v987_v53 = vpop.xlane.xlu1 %986 }
 0x244   : > { %1900 = vrcp.f32 %v987_v53 }
 0x247   : > { %v990_v28 = vpop.xlane.xlu0 %989 }
 0x248   : > { %1902 = vrcp.f32 %v990_v28 }
 0x24b   : > { %v993_v30 = vpop.xlane.xlu1 %992 }
 0x24c   : > { %1904 = vrcp.f32 %v993_v30  ;;  %v1408_v30 = vld [vmem:[%s2448_s11 + $0x38] sm:$0xff] }
 0x24d   : > { %v1899_v32 = vpop.eup %1898 }
 0x24e   : > { %v1337_v33 = vmul.f32 %v1899_v32, %v2442_v6 }
 0x24f   : > { %v996_v5 = vpop.xlane.xlu0 %995 }
 0x250   : > { %1906 = vrcp.f32 %v996_v5 }
 0x251   : > { %v1901_v10 = vpop.eup %1900 }
 0x252   : > { %v1338_v8 = vmul.f32 %v1901_v10, %v2442_v6 }
 0x253   : > { %v999_v36 = vpop.xlane.xlu1 %998 }
 0x254   : > { %1908 = vrcp.f32 %v999_v36 }
 0x255   : > { %v1903_v9 = vpop.eup %1902 }
 0x256   : > { %v1339_v42 = vmul.f32 %v1903_v9, %v2442_v6 }
 0x257   : > { %v1002_v58 = vpop.xlane.xlu0 %1001 }
 0x258   : > { %1910 = vrcp.f32 %v1002_v58 }
 0x259   : > { %v1905_v57 = vpop.eup %1904 }
 0x25a   : > { %v1340_v61 = vmul.f32 %v1905_v57, %v2442_v6 }
 0x25b   : > { %v1005_v11 = vpop.xlane.xlu1 %1004 }
 0x25c   : > { %1912 = vrcp.f32 %v1005_v11 }
 0x25d   : > { %v1907_v43 = vpop.eup %1906 }
 0x25e   : > { %v1341_v13 = vmul.f32 %v1907_v43, %v2442_v6 }
 0x25f   : > { %v1008_v22 = vpop.xlane.xlu0 %1007 }
 0x260   : > { %1914 = vrcp.f32 %v1008_v22 }
 0x261   : > { %v1909_v16 = vpop.eup %1908 }
 0x262   : > { %v1342_v18 = vmul.f32 %v1909_v16, %v2442_v6 }
 0x263   : > { %v1011_v31 = vpop.xlane.xlu1 %1010 }
 0x264   : > { %1916 = vrcp.f32 %v1011_v31 }
 0x265   : > { %v1911_v20 = vpop.eup %1910 }
 0x266   : > { %v1343_v26 = vmul.f32 %v1911_v20, %v2442_v6 }
 0x267   : > { %v1014_v46 = vpop.xlane.xlu0 %1013 }
 0x268   : > { %1918 = vrcp.f32 %v1014_v46 }
 0x269   : > { %v1913_v4 = vpop.eup %1912 }
 0x26a   : > { %v1344_v21 = vmul.f32 %v1913_v4, %v2442_v6 }
 0x26b   : > { %v1017_v2 = vpop.xlane.xlu1 %1016 }
 0x26c   : > { %1920 = vrcp.f32 %v1017_v2 }
 0x26d   : > { %v1915_v51 = vpop.eup %1914 }
 0x26e   : > { %v1345_v10 = vmul.f32 %v1915_v51, %v2442_v6 }
 0x26f   : > { %v1020_v53 = vpop.xlane.xlu0 %1019 }
 0x270   : > { %1922 = vrcp.f32 %v1020_v53 }
 0x271   : > { %v1917_v36 = vpop.eup %1916 }
 0x272   : > { %v1346_v9 = vmul.f32 %v1917_v36, %v2442_v6 }
 0x275   : > { %v1144_v34 = vpop.f32.mrf.mxu1  ;;  %v1919_v58 = vpop.eup %1918 }
 0x276   : > { %v1369_v37 = vmul.f32 %v1337_v33, %v1144_v34  ;;  %v1023_v34 = vpop.xlane.xlu1 %1022  ;;  %v1347_v57 = vmul.f32 %v1919_v58, %v2442_v6 }
 0x277   : > { %v1146_v38 = vpop.f32.mrf.mxu1  ;;  %1924 = vrcp.f32 %v1023_v34 }
 0x278   : > { %v1433_v56 = vadd.f32 %v1401_v35, %v1369_v37  ;;  %v1409_v37 = vld [vmem:[%s2448_s11 + $0x40] sm:$0xff] }
 0x279   : > { %v1149_v39 = vpop.f32.mrf.mxu1  ;;  %v1921_v11 = vpop.eup %1920 }
 0x27a   : > { %1466 = vst.msk [vmem:[%s2456_s14] sm:$0xff] %vm1465_vm0, %v1433_v56  ;;  %v1370_v52 = vmul.f32 %v1338_v8, %v1149_v39  ;;  %v1026_v39 = vpop.xlane.xlu0 %1025  ;;  %v1348_v43 = vmul.f32 %v1921_v11, %v2442_v6 }
 0x27b   : > { %v1151_v17 = vpop.f32.mrf.mxu1  ;;  %1926 = vrcp.f32 %v1026_v39 }
 0x27c   : > { %v1434_v19 = vadd.f32 %v1402_v40, %v1370_v52  ;;  %v1410_v52 = vld [vmem:[%s2448_s11 + $0x48] sm:$0xff] }
 0x27d   : > { %v1154_v44 = vpop.f32.mrf.mxu1  ;;  %v1923_v22 = vpop.eup %1922 }
 0x27e   : > { %1467 = vst.msk [vmem:[%s2456_s14 + $0x8] sm:$0xff] %vm1465_vm0, %v1434_v19  ;;  %v1371_v12 = vmul.f32 %v1339_v42, %v1154_v44  ;;  %v1029_v44 = vpop.xlane.xlu1 %1028  ;;  %v1349_v16 = vmul.f32 %v1923_v22, %v2442_v6 }
 0x27f   : > { %v1156_v41 = vpop.f32.mrf.mxu1  ;;  %1928 = vrcp.f32 %v1029_v44 }
 0x280   : > { %v1435_v60 = vadd.f32 %v1403_v45, %v1371_v12  ;;  %v1411_v12 = vld [vmem:[%s2448_s11 + $0x50] sm:$0xff] }
 0x281   : > { %v1159_v49 = vpop.f32.mrf.mxu1 }
 0x282   : > { %1468 = vst.msk [vmem:[%s2456_s14 + $0x10] sm:$0xff] %vm1465_vm0, %v1435_v60  ;;  %v1372_v24 = vmul.f32 %v1340_v61, %v1159_v49  ;;  %v1032_v49 = vpop.xlane.xlu0 %1031 }
 0x283   : > { %v1161_v14 = vpop.f32.mrf.mxu1  ;;  %1930 = vrcp.f32 %v1032_v49 }
 0x284   : > { %v1436_v15 = vadd.f32 %v1404_v50, %v1372_v24  ;;  %v1412_v24 = vld [vmem:[%s2448_s11 + $0x58] sm:$0xff]  ;;  %v1925_v31 = vpop.eup %1924 }
 0x285   : > { %v1164_v54 = vpop.f32.mrf.mxu1  ;;  %v1350_v20 = vmul.f32 %v1925_v31, %v2442_v6 }
 0x286   : > { %1469 = vst.msk [vmem:[%s2456_s14 + $0x18] sm:$0xff] %vm1465_vm0, %v1436_v15  ;;  %v1373_v63 = vmul.f32 %v1341_v13, %v1164_v54  ;;  %v1035_v54 = vpop.xlane.xlu1 %1034 }
 0x287   : > { %v1166_v1 = vpop.f32.mrf.mxu1  ;;  %1932 = vrcp.f32 %v1035_v54 }
 0x288   : > { %v1437_v27 = vadd.f32 %v1405_v55, %v1373_v63  ;;  %v1413_v63 = vld [vmem:[%s2448_s11 + $0x60] sm:$0xff]  ;;  %v1927_v46 = vpop.eup %1926 }
 0x289   : > { %v1169_v48 = vpop.f32.mrf.mxu1  ;;  %v1351_v4 = vmul.f32 %v1927_v46, %v2442_v6 }
 0x28a   : > { %1470 = vst.msk [vmem:[%s2456_s14 + $0x20] sm:$0xff] %vm1465_vm0, %v1437_v27  ;;  %v1374_v59 = vmul.f32 %v1342_v18, %v1169_v48  ;;  %v1038_v48 = vpop.xlane.xlu0 %1037 }
 0x28b   : > { %v1171_v62 = vpop.f32.mrf.mxu1  ;;  %1934 = vrcp.f32 %v1038_v48 }
 0x28c   : > { %v1438_v29 = vadd.f32 %v1406_v0, %v1374_v59  ;;  %v1414_v59 = vld [vmem:[%s2448_s11 + $0x68] sm:$0xff]  ;;  %v1929_v2 = vpop.eup %1928 }
 0x28d   : > { %v1174_v23 = vpop.f32.mrf.mxu1  ;;  %v1352_v51 = vmul.f32 %v1929_v2, %v2442_v6 }
 0x28e   : > { %1471 = vst.msk [vmem:[%s2456_s14 + $0x28] sm:$0xff] %vm1465_vm0, %v1438_v29  ;;  %v1375_v3 = vmul.f32 %v1343_v26, %v1174_v23  ;;  %v1041_v23 = vpop.xlane.xlu1 %1040 }
 0x28f   : > { %v1176_v7 = vpop.f32.mrf.mxu1  ;;  %1936 = vrcp.f32 %v1041_v23 }
 0x290   : > { %v1439_v47 = vadd.f32 %v1407_v25, %v1375_v3  ;;  %v1415_v3 = vld [vmem:[%s2448_s11 + $0x70] sm:$0xff]  ;;  %v1931_v53 = vpop.eup %1930 }
 0x291   : > { %v1179_v28 = vpop.f32.mrf.mxu1  ;;  %v1353_v36 = vmul.f32 %v1931_v53, %v2442_v6 }
 0x292   : > { %1472 = vst.msk [vmem:[%s2456_s14 + $0x30] sm:$0xff] %vm1465_vm0, %v1439_v47  ;;  %v1376_v32 = vmul.f32 %v1344_v21, %v1179_v28  ;;  %v1044_v28 = vpop.xlane.xlu0 %1043 }
 0x293   : > { %v1181_v5 = vpop.f32.mrf.mxu1  ;;  %1938 = vrcp.f32 %v1044_v28 }
 0x294   : > { %v1440_v33 = vadd.f32 %v1408_v30, %v1376_v32  ;;  %v1416_v32 = vld [vmem:[%s2448_s11 + $0x78] sm:$0xff]  ;;  %v1933_v34 = vpop.eup %1932 }
 0x295   : > { %v1184_v35 = vpop.f32.mrf.mxu1  ;;  %v1354_v58 = vmul.f32 %v1933_v34, %v2442_v6 }
 0x296   : > { %1473 = vst.msk [vmem:[%s2456_s14 + $0x38] sm:$0xff] %vm1465_vm0, %v1440_v33  ;;  %v1377_v38 = vmul.f32 %v1345_v10, %v1184_v35  ;;  %v1047_v35 = vpop.xlane.xlu1 %1046 }
 0x297   : > { %v1186_v56 = vpop.f32.mrf.mxu1  ;;  %1940 = vrcp.f32 %v1047_v35 }
 0x298   : > { %v1441_v8 = vadd.f32 %v1409_v37, %v1377_v38  ;;  %v1417_v38 = vld [vmem:[%s2448_s11 + $0x80] sm:$0xff]  ;;  %v1935_v39 = vpop.eup %1934 }
 0x299   : > { %v1189_v40 = vpop.f32.mrf.mxu1  ;;  %v1355_v11 = vmul.f32 %v1935_v39, %v2442_v6 }
 0x29a   : > { %1474 = vst.msk [vmem:[%s2456_s14 + $0x40] sm:$0xff] %vm1465_vm0, %v1441_v8  ;;  %v1378_v17 = vmul.f32 %v1346_v9, %v1189_v40  ;;  %v1050_v40 = vpop.xlane.xlu0 %1049 }
 0x29b   : > { %v1191_v19 = vpop.f32.mrf.mxu1  ;;  %1942 = vrcp.f32 %v1050_v40 }
 0x29c   : > { %v1442_v42 = vadd.f32 %v1410_v52, %v1378_v17  ;;  %v1418_v17 = vld [vmem:[%s2448_s11 + $0x88] sm:$0xff]  ;;  %v1937_v44 = vpop.eup %1936 }
 0x29d   : > { %v1194_v45 = vpop.f32.mrf.mxu1  ;;  %v1356_v22 = vmul.f32 %v1937_v44, %v2442_v6 }
 0x29e   : > { %1475 = vst.msk [vmem:[%s2456_s14 + $0x48] sm:$0xff] %vm1465_vm0, %v1442_v42  ;;  %v1379_v41 = vmul.f32 %v1347_v57, %v1194_v45  ;;  %v1053_v45 = vpop.xlane.xlu1 %1052 }
 0x29f   : > { %v1196_v60 = vpop.f32.mrf.mxu1  ;;  %1944 = vrcp.f32 %v1053_v45 }
 0x2a0   : > { %v1443_v61 = vadd.f32 %v1411_v12, %v1379_v41  ;;  %v1419_v41 = vld [vmem:[%s2448_s11 + $0x90] sm:$0xff]  ;;  %v1939_v49 = vpop.eup %1938 }
 0x2a1   : > { %v1199_v50 = vpop.f32.mrf.mxu1  ;;  %v1357_v31 = vmul.f32 %v1939_v49, %v2442_v6 }
 0x2a2   : > { %1476 = vst.msk [vmem:[%s2456_s14 + $0x50] sm:$0xff] %vm1465_vm0, %v1443_v61  ;;  %v1380_v14 = vmul.f32 %v1348_v43, %v1199_v50  ;;  %v1056_v50 = vpop.xlane.xlu0 %1055 }
 0x2a3   : > { %v1201_v15 = vpop.f32.mrf.mxu1  ;;  %1946 = vrcp.f32 %v1056_v50 }
 0x2a4   : > { %v1444_v13 = vadd.f32 %v1412_v24, %v1380_v14  ;;  %v1420_v14 = vld [vmem:[%s2448_s11 + $0x98] sm:$0xff]  ;;  %v1941_v54 = vpop.eup %1940 }
 0x2a5   : > { %v1204_v55 = vpop.f32.mrf.mxu1  ;;  %v1358_v46 = vmul.f32 %v1941_v54, %v2442_v6 }
 0x2a6   : > { %1477 = vst.msk [vmem:[%s2456_s14 + $0x58] sm:$0xff] %vm1465_vm0, %v1444_v13  ;;  %v1381_v1 = vmul.f32 %v1349_v16, %v1204_v55  ;;  %v1059_v55 = vpop.xlane.xlu1 %1058 }
 0x2a7   : > { %v1206_v27 = vpop.f32.mrf.mxu1  ;;  %1948 = vrcp.f32 %v1059_v55 }
 0x2a8   : > { %v1445_v18 = vadd.f32 %v1413_v63, %v1381_v1  ;;  %v1421_v1 = vld [vmem:[%s2448_s11 + $0xa0] sm:$0xff]  ;;  %v1943_v48 = vpop.eup %1942 }
 0x2a9   : > { %v1209_v0 = vpop.f32.mrf.mxu1  ;;  %v1359_v2 = vmul.f32 %v1943_v48, %v2442_v6 }
 0x2aa   : > { %1478 = vst.msk [vmem:[%s2456_s14 + $0x60] sm:$0xff] %vm1465_vm0, %v1445_v18  ;;  %v1382_v62 = vmul.f32 %v1350_v20, %v1209_v0  ;;  %v1062_v0 = vpop.xlane.xlu0 %1061 }
 0x2ab   : > { %v1211_v29 = vpop.f32.mrf.mxu1  ;;  %1950 = vrcp.f32 %v1062_v0  ;;  %v1430_v0 = vld [vmem:[%s2448_s11 + $0xe8] sm:$0xff] }
 0x2ac   : > { %v1446_v26 = vadd.f32 %v1414_v59, %v1382_v62  ;;  %v1422_v62 = vld [vmem:[%s2448_s11 + $0xa8] sm:$0xff]  ;;  %v1945_v23 = vpop.eup %1944 }
 0x2ad   : > { %v1214_v25 = vpop.f32.mrf.mxu1  ;;  %v1360_v53 = vmul.f32 %v1945_v23, %v2442_v6  ;;  %v1431_v23 = vld [vmem:[%s2448_s11 + $0xf0] sm:$0xff] }
 0x2ae   : > { %1479 = vst.msk [vmem:[%s2456_s14 + $0x68] sm:$0xff] %vm1465_vm0, %v1446_v26  ;;  %v1383_v7 = vmul.f32 %v1351_v4, %v1214_v25  ;;  %v1065_v25 = vpop.xlane.xlu1 %1064 }
 0x2af   : > { %v1216_v47 = vpop.f32.mrf.mxu1  ;;  %1952 = vrcp.f32 %v1065_v25 }
 0x2b0   : > { %v1447_v21 = vadd.f32 %v1415_v3, %v1383_v7  ;;  %v1423_v7 = vld [vmem:[%s2448_s11 + $0xb0] sm:$0xff]  ;;  %v1947_v28 = vpop.eup %1946 }
 0x2b1   : > { %v1219_v30 = vpop.f32.mrf.mxu1  ;;  %v1361_v34 = vmul.f32 %v1947_v28, %v2442_v6 }
 0x2b2   : > { %1480 = vst.msk [vmem:[%s2456_s14 + $0x70] sm:$0xff] %vm1465_vm0, %v1447_v21  ;;  %v1384_v5 = vmul.f32 %v1352_v51, %v1219_v30  ;;  %v1068_v30 = vpop.xlane.xlu0 %1067 }
 0x2b3   : > { %v1221_v33 = vpop.f32.mrf.mxu1  ;;  %1954 = vrcp.f32 %v1068_v30 }
 0x2b4   : > { %v1448_v10 = vadd.f32 %v1416_v32, %v1384_v5  ;;  %v1424_v5 = vld [vmem:[%s2448_s11 + $0xb8] sm:$0xff]  ;;  %v1949_v35 = vpop.eup %1948 }
 0x2b5   : > { %v1224_v37 = vpop.f32.mrf.mxu1  ;;  %v1362_v39 = vmul.f32 %v1949_v35, %v2442_v6 }
 0x2b6   : > { %1481 = vst.msk [vmem:[%s2456_s14 + $0x78] sm:$0xff] %vm1465_vm0, %v1448_v10  ;;  %v1385_v56 = vmul.f32 %v1353_v36, %v1224_v37  ;;  %v1071_v37 = vpop.xlane.xlu1 %1070 }
 0x2b7   : > { %v1226_v8 = vpop.f32.mrf.mxu1  ;;  %1956 = vrcp.f32 %v1071_v37 }
 0x2b8   : > { %v1449_v9 = vadd.f32 %v1417_v38, %v1385_v56  ;;  %v1425_v56 = vld [vmem:[%s2448_s11 + $0xc0] sm:$0xff]  ;;  %v1951_v40 = vpop.eup %1950 }
 0x2b9   : > { %v1229_v52 = vpop.f32.mrf.mxu1  ;;  %v1363_v44 = vmul.f32 %v1951_v40, %v2442_v6 }
 0x2ba   : > { %1482 = vst.msk [vmem:[%s2456_s14 + $0x80] sm:$0xff] %vm1465_vm0, %v1449_v9  ;;  %v1386_v19 = vmul.f32 %v1354_v58, %v1229_v52  ;;  %v1074_v52 = vpop.xlane.xlu0 %1073 }
 0x2bb   : > { %v1231_v42 = vpop.f32.mrf.mxu1  ;;  %1958 = vrcp.f32 %v1074_v52 }
 0x2bc   : > { %v1450_v57 = vadd.f32 %v1418_v17, %v1386_v19  ;;  %v1426_v19 = vld [vmem:[%s2448_s11 + $0xc8] sm:$0xff]  ;;  %v1953_v45 = vpop.eup %1952 }
 0x2bd   : > { %v1234_v12 = vpop.f32.mrf.mxu1  ;;  %v1364_v49 = vmul.f32 %v1953_v45, %v2442_v6 }
 0x2be   : > { %1483 = vst.msk [vmem:[%s2456_s14 + $0x88] sm:$0xff] %vm1465_vm0, %v1450_v57  ;;  %v1387_v60 = vmul.f32 %v1355_v11, %v1234_v12  ;;  %v1077_v12 = vpop.xlane.xlu1 %1076 }
 0x2bf   : > { %v1236_v61 = vpop.f32.mrf.mxu1  ;;  %1960 = vrcp.f32 %v1077_v12 }
 0x2c0   : > { %v1451_v43 = vadd.f32 %v1419_v41, %v1387_v60  ;;  %v1427_v60 = vld [vmem:[%s2448_s11 + $0xd0] sm:$0xff]  ;;  %v1955_v50 = vpop.eup %1954 }
 0x2c1   : > { %v1239_v24 = vpop.f32.mrf.mxu1 }
 0x2c2   : > { %1484 = vst.msk [vmem:[%s2456_s14 + $0x90] sm:$0xff] %vm1465_vm0, %v1451_v43  ;;  %v1388_v15 = vmul.f32 %v1356_v22, %v1239_v24 }
 0x2c3   : > { %v1241_v13 = vpop.f32.mrf.mxu1 }
 0x2c4   : > { %v1452_v16 = vadd.f32 %v1420_v14, %v1388_v15  ;;  %v1428_v14 = vld [vmem:[%s2448_s11 + $0xd8] sm:$0xff]  ;;  %v1957_v54 = vpop.eup %1956 }
 0x2c5   : > { %v1244_v63 = vpop.f32.mrf.mxu1 }
 0x2c6   : > { %1485 = vst.msk [vmem:[%s2456_s14 + $0x98] sm:$0xff] %vm1465_vm0, %v1452_v16  ;;  %v1389_v27 = vmul.f32 %v1357_v31, %v1244_v63  ;;  %v1365_v31 = vmul.f32 %v1955_v50, %v2442_v6  ;;  %v1429_v63 = vld [vmem:[%s2448_s11 + $0xe0] sm:$0xff] }
 0x2c7   : > { %v1246_v18 = vpop.f32.mrf.mxu1 }
 0x2c8   : > { %v1453_v20 = vadd.f32 %v1421_v1, %v1389_v27 }
 0x2c9   : > { %v1249_v59 = vpop.f32.mrf.mxu1 }
 0x2ca   : > { %1486 = vst.msk [vmem:[%s2456_s14 + $0xa0] sm:$0xff] %vm1465_vm0, %v1453_v20  ;;  %v1390_v29 = vmul.f32 %v1358_v46, %v1249_v59  ;;  %v1366_v20 = vmul.f32 %v1957_v54, %v2442_v6  ;;  %v1959_v46 = vpop.eup %1958 }
 0x2cb   : > { %v1251_v26 = vpop.f32.mrf.mxu1 }
 0x2cc   : > { %v1454_v4 = vadd.f32 %v1422_v62, %v1390_v29  ;;  %v1367_v26 = vmul.f32 %v1959_v46, %v2442_v6 }
 0x2cd   : > { %v1254_v3 = vpop.f32.mrf.mxu1 }
 0x2ce   : > { %1487 = vst.msk [vmem:[%s2456_s14 + $0xa8] sm:$0xff] %vm1465_vm0, %v1454_v4  ;;  %v1391_v47 = vmul.f32 %v1359_v2, %v1254_v3  ;;  %v1961_v4 = vpop.eup %1960 }
 0x2cf   : > { %v1256_v21 = vpop.f32.mrf.mxu1 }
 0x2d0   : > { %v1455_v51 = vadd.f32 %v1423_v7, %v1391_v47  ;;  %v1368_v47 = vmul.f32 %v1961_v4, %v2442_v6 }
 0x2d1   : > { %v1259_v32 = vpop.f32.mrf.mxu1 }
 0x2d2   : > { %1488 = vst.msk [vmem:[%s2456_s14 + $0xb0] sm:$0xff] %vm1465_vm0, %v1455_v51  ;;  %v1392_v33 = vmul.f32 %v1360_v53, %v1259_v32  ;;  %v1432_v51 = vld [vmem:[%s2448_s11 + $0xf8] sm:$0xff] }
 0x2d3   : > { %v1261_v10 = vpop.f32.mrf.mxu1 }
 0x2d4   : > { %v1456_v36 = vadd.f32 %v1424_v5, %v1392_v33 }
 0x2d5   : > { %v1264_v38 = vpop.f32.mrf.mxu1 }
 0x2d6   : > { %1489 = vst.msk [vmem:[%s2456_s14 + $0xb8] sm:$0xff] %vm1465_vm0, %v1456_v36  ;;  %v1393_v8 = vmul.f32 %v1361_v34, %v1264_v38 }
 0x2d7   : > { %v1266_v9 = vpop.f32.mrf.mxu1 }
 0x2d8   : > { %v1457_v58 = vadd.f32 %v1425_v56, %v1393_v8 }
 0x2d9   : > { %v1269_v17 = vpop.f32.mrf.mxu1 }
 0x2da   : > { %1490 = vst.msk [vmem:[%s2456_s14 + $0xc0] sm:$0xff] %vm1465_vm0, %v1457_v58  ;;  %v1394_v42 = vmul.f32 %v1362_v39, %v1269_v17 }
 0x2db   : > { %v1271_v57 = vpop.f32.mrf.mxu1 }
 0x2dc   : > { %v1458_v11 = vadd.f32 %v1426_v19, %v1394_v42 }
 0x2dd   : > { %v1274_v41 = vpop.f32.mrf.mxu1 }
 0x2de   : > { %1491 = vst.msk [vmem:[%s2456_s14 + $0xc8] sm:$0xff] %vm1465_vm0, %v1458_v11  ;;  %v1395_v61 = vmul.f32 %v1363_v44, %v1274_v41 }
 0x2df   : > { %v1276_v43 = vpop.f32.mrf.mxu1 }
 0x2e0   : > { %v1459_v22 = vadd.f32 %v1427_v60, %v1395_v61 }
 0x2e1   : > { %v1279_v24 = vpop.f32.mrf.mxu1 }
 0x2e2   : > { %1492 = vst.msk [vmem:[%s2456_s14 + $0xd0] sm:$0xff] %vm1465_vm0, %v1459_v22  ;;  %v1396_v15 = vmul.f32 %v1364_v49, %v1279_v24 }
 0x2e3   : > { %v1281_v13 = vpop.f32.mrf.mxu1 }
 0x2e4   : > { %v1460_v16 = vadd.f32 %v1428_v14, %v1396_v15 }
 0x2e5   : > { %v1284_v55 = vpop.f32.mrf.mxu1 }
 0x2e6   : > { %1493 = vst.msk [vmem:[%s2456_s14 + $0xd8] sm:$0xff] %vm1465_vm0, %v1460_v16  ;;  %v1397_v1 = vmul.f32 %v1365_v31, %v1284_v55 }
 0x2e7   : > { %v1286_v27 = vpop.f32.mrf.mxu1 }
 0x2e8   : > { %v1461_v18 = vadd.f32 %v1429_v63, %v1397_v1 }
 0x2e9   : > { %v1289_v48 = vpop.f32.mrf.mxu1 }
 0x2ea   : > { %1494 = vst.msk [vmem:[%s2456_s14 + $0xe0] sm:$0xff] %vm1465_vm0, %v1461_v18  ;;  %v1398_v59 = vmul.f32 %v1366_v20, %v1289_v48 }
 0x2eb   : > { %v1291_v62 = vpop.f32.mrf.mxu1 }
 0x2ec   : > { %v1462_v29 = vadd.f32 %v1430_v0, %v1398_v59 }
 0x2ed   : > { %v1294_v2 = vpop.f32.mrf.mxu1 }
 0x2ee   : > { %1495 = vst.msk [vmem:[%s2456_s14 + $0xe8] sm:$0xff] %vm1465_vm0, %v1462_v29  ;;  %v1399_v25 = vmul.f32 %v1367_v26, %v1294_v2 }
 0x2ef   : > { %v1296_v3 = vpop.f32.mrf.mxu1 }
 0x2f0   : > { %v1463_v7 = vadd.f32 %v1431_v23, %v1399_v25 }
 0x2f1   : > { %v1299_v21 = vpop.f32.mrf.mxu1 }
 0x2f2   : > { %1496 = vst.msk [vmem:[%s2456_s14 + $0xf0] sm:$0xff] %vm1465_vm0, %v1463_v7  ;;  %v1400_v53 = vmul.f32 %v1368_v47, %v1299_v21 }
 0x2f3   : > { %v1301_v28 = vpop.f32.mrf.mxu1 }
 0x2f4   : > { %v1464_v30 = vadd.f32 %v1432_v51, %v1400_v53 }
 0x2f6   : > { %1497 = vst.msk [vmem:[%s2456_s14 + $0xf8] sm:$0xff] %vm1465_vm0, %v1464_v30 }
 0x2f7 PF: > { %s16_s22 = sadd.s32 1, %s1984_s22   ;;  %s2638_s20 = smov %s1980_s21 }
 0x2f8   : > { %p13_p5 = scmp.ge.s32.totalorder %s16_s22, 4   ;;  %s2639_s21 = smov %s2641_s0 }
 0x2fa   :  { %15 = sbr.rel (!%p13_p5) target bundleno = 2 (0x2), region = 79 }

</bundles_post_ra>
